<compile_context>
chip_gen: v7x
topology: tpu7x:2x2x1
jax: 0.10.0
libtpu: 0.0.40
codegen_flags: <defaults>
</compile_context>

<pallas_src>
import functools

import jax
import jax.numpy as jnp
import numpy as np
from jax.experimental import pallas as pl
from jax.experimental.pallas import tpu as pltpu


# ----------------------------- Pallas kernel --------------------------------
def deconv_kernel(w_ref, b_ref, x_ref, o_ref, *, ksize, wpad, relu):
    """One batch element per grid step.

    w_ref : VMEM (K*K, Cout, Cin) f32   flipped/channel-transposed weight taps
    b_ref : VMEM (Cout, 1) f32          bias (broadcast along lanes)
    x_ref : VMEM (1, Cin, Lin) f32      flattened zero-padded unpooled input
                                        (Lin = Hpad*Wpad + K-1 tail pad)
    o_ref : VMEM (1, Cout, L) f32       flat output, L = Ho*Wpad (cols >= Wo are
                                        wrap-around garbage, cropped by the wrapper)
    """
    cout = o_ref.shape[1]
    L = o_ref.shape[2]

    acc = jnp.zeros((cout, L), jnp.float32)
    for kh in range(ksize):
        for kw in range(ksize):
            t = kh * ksize + kw
            d = kh * wpad + kw                       # static tap shift in flat space
            acc = acc + jnp.dot(
                w_ref[t, :, :],                      # (Cout, Cin)
                x_ref[0, :, pl.ds(d, L)],            # (Cin, L) lane-dense slice
                preferred_element_type=jnp.float32,  # MXU, f32 accumulate
            )
    acc = acc + b_ref[...]                           # (Cout, 1) broadcast along lanes

    if relu:
        out = jnp.maximum(acc, 0.0)
    else:
        out = jax.nn.sigmoid(acc)
    o_ref[0, :, :] = out.astype(o_ref.dtype)


# ------------------------------ JAX glue -------------------------------------
def max_unpool2d(x, idx, pre_pool_dims):
    """nn.MaxUnpool2d(kernel_size=2), scatter-free: 2x upsample + index-compare mask."""
    B, C, H, W = x.shape
    _, _, Hp, Wp = pre_pool_dims
    x_up = jnp.repeat(jnp.repeat(x, 2, axis=2), 2, axis=3)
    i_up = jnp.repeat(jnp.repeat(idx.astype(jnp.int32), 2, axis=2), 2, axis=3)
    ph, pw = Hp - 2 * H, Wp - 2 * W
    if ph or pw:  # odd pre-pool dims: last row/col is never a pool target -> zeros
        x_up = jnp.pad(x_up, ((0, 0), (0, 0), (0, ph), (0, pw)))
        i_up = jnp.pad(i_up, ((0, 0), (0, 0), (0, ph), (0, pw)), constant_values=-1)
    tgt = (jnp.arange(Hp)[:, None] * Wp + jnp.arange(Wp)[None, :]).astype(jnp.int32)
    return jnp.where(i_up == tgt[None, None], x_up, jnp.zeros((), x.dtype))


def deconv_layer_forward(x, pool_index, pre_pool_dims, weight, bias,
                         dropout=False, final_layer=False):
    """Forward pass of DeConvLayer (NCHW).

    weight: (in_channels, out_channels, K, K)  -- PyTorch ConvTranspose2d layout
    bias  : (out_channels,)
    """
    B, Cin, H, W = x.shape
    _, _, Hp, Wp = pre_pool_dims
    K = weight.shape[2]
    Cout = weight.shape[1]
    Ho, Wo = Hp + K - 1, Wp + K - 1
    Hpad, Wpad = Hp + 2 * (K - 1), Wp + 2 * (K - 1)
    L = Ho * Wpad                    # lane-dense flat output length per channel
    Lin = Hpad * Wpad + (K - 1)      # flat input length (+ tail pad for last-row tap reads)

    # 1) MaxUnpool2d (vectorized, no scatter) -- fuses with the pad/flatten below in XLA.
    unpooled = max_unpool2d(x, pool_index, pre_pool_dims)

    # 2) Dropout2d: identity in eval mode / dropout=False.

    # 3) ConvTranspose2d(stride=1, pad=0) == full correlation of zero-padded input with
    #    Wf[co, ci, a, b] = W[ci, co, K-1-a, K-1-b].  Flatten spatially with row stride Wpad.
    xpad = jnp.pad(unpooled, ((0, 0), (0, 0), (K - 1, K - 1), (K - 1, K - 1)))
    xflat = xpad.reshape(B, Cin, Hpad * Wpad).astype(jnp.float32)
    xflat = jnp.pad(xflat, ((0, 0), (0, 0), (0, K - 1)))

    wf = jnp.flip(weight, axis=(2, 3)).transpose(1, 0, 2, 3)              # (Cout,Cin,K,K)
    wtaps = wf.transpose(2, 3, 0, 1).reshape(K * K, Cout, Cin).astype(jnp.float32)
    b2d = bias.reshape(Cout, 1).astype(jnp.float32)

    kernel = functools.partial(deconv_kernel, ksize=K, wpad=Wpad,
                               relu=(not final_layer))

    out_flat = pl.pallas_call(
        kernel,
        out_shape=jax.ShapeDtypeStruct((B, Cout, L), jnp.float32),
        grid=(B,),
        in_specs=[
            pl.BlockSpec((K * K, Cout, Cin), lambda b: (0, 0, 0)),  # weight taps (VMEM)
            pl.BlockSpec((Cout, 1), lambda b: (0, 0)),              # bias (VMEM)
            pl.BlockSpec((1, Cin, Lin), lambda b: (b, 0, 0)),       # flat padded input
        ],
        out_specs=pl.BlockSpec((1, Cout, L), lambda b: (b, 0, 0)),
        compiler_params=pltpu.CompilerParams(dimension_semantics=("parallel",)),
    )(wtaps, b2d, xflat)

    # Crop the wrap-around columns and restore NCHW.
    out = out_flat.reshape(B, Cout, Ho, Wpad)[:, :, :, :Wo]
    return out


# -------------------------- helpers for test setup ---------------------------
def max_pool2d_with_indices(y):
    """Simulate nn.MaxPool2d(kernel_size=2, return_indices=True) (NCHW)."""
    B, C, Hp, Wp = y.shape
    H, W = Hp // 2, Wp // 2
    yw = y.reshape(B, C, H, 2, W, 2).transpose(0, 1, 2, 4, 3, 5).reshape(B, C, H, W, 4)
    arg = jnp.argmax(yw, axis=-1)
    val = jnp.max(yw, axis=-1)
    dh, dw = arg // 2, arg % 2
    oh = 2 * jnp.arange(H)[None, None, :, None] + dh
    ow = 2 * jnp.arange(W)[None, None, None, :] + dw
    idx = (oh * Wp + ow).astype(jnp.int32)
    return val, idx


def numpy_reference(x, idx, pre_pool_dims, weight, bias, final_layer):
    x = np.asarray(x, np.float64)
    idx = np.asarray(idx)
    w = np.asarray(weight, np.float64)
    b = np.asarray(bias, np.float64)
    B, Cin, H, W = x.shape
    _, _, Hp, Wp = pre_pool_dims
    K = w.shape[2]
    Cout = w.shape[1]
    un = np.zeros((B, Cin, Hp * Wp))
    for bb in range(B):
        for c in range(Cin):
            un[bb, c][idx[bb, c].reshape(-1)] = x[bb, c].reshape(-1)
    un = un.reshape(B, Cin, Hp, Wp)
    xpad = np.pad(un, ((0, 0), (0, 0), (K - 1, K - 1), (K - 1, K - 1)))
    wf = np.flip(w, axis=(2, 3)).transpose(1, 0, 2, 3)
    Ho, Wo = Hp + K - 1, Wp + K - 1
    out = np.zeros((B, Cout, Ho, Wo))
    for kh in range(K):
        for kw in range(K):
            out += np.einsum("oc,bchw->bohw", wf[:, :, kh, kw],
                             xpad[:, :, kh:kh + Ho, kw:kw + Wo])
    out += b[None, :, None, None]
    if final_layer:
        return 1.0 / (1.0 + np.exp(-out))
    return np.maximum(out, 0.0)


# ---------------------------------- main --------------------------------------
if __name__ == "__main__":
    key = jax.random.PRNGKey(0)
    k_w, k_b, k_x = jax.random.split(key, 3)

    B, Cin, Cout, K = 2, 4, 4, 5
    Hp = Wp = 16                       # pre-pool spatial dims
    pre_pool_dims = (B, Cin, Hp, Wp)   # torch.Size prior to MaxPool2d(2)

    # deterministic ConvTranspose2d params: weight (Cin, Cout, K, K), bias (Cout,)
    weight = jax.random.normal(k_w, (Cin, Cout, K, K), dtype=jnp.float32) * 0.1
    bias = jax.random.normal(k_b, (Cout,), dtype=jnp.float32) * 0.1

    # build a consistent (pooled values, pool indices) pair via a simulated MaxPool2d(2)
    pre_pool = jax.random.normal(k_x, (B, Cin, Hp, Wp), dtype=jnp.float32)
    x, pool_index = max_pool2d_with_indices(pre_pool)   # x: (2, 4, 8, 8)

    # non-final layer: ReLU
    out_relu = deconv_layer_forward(x, pool_index, pre_pool_dims, weight, bias,
                                    dropout=False, final_layer=False)
    out_relu = jax.block_until_ready(out_relu)
    ref_relu = numpy_reference(x, pool_index, pre_pool_dims, weight, bias, False)
    assert out_relu.shape == (B, Cout, Hp + K - 1, Wp + K - 1)
    # tolerance loosened slightly vs. exact-VPU version: MXU matmul accumulation
    assert np.allclose(np.asarray(out_relu), ref_relu, atol=2e-2, rtol=2e-2)

    # final layer: Sigmoid
    out_sig = deconv_layer_forward(x, pool_index, pre_pool_dims, weight, bias,
                                   dropout=False, final_layer=True)
    out_sig = jax.block_until_ready(out_sig)
    ref_sig = numpy_reference(x, pool_index, pre_pool_dims, weight, bias, True)
    assert np.allclose(np.asarray(out_sig), ref_sig, atol=2e-2, rtol=2e-2)

    print("KERNEL_OK")
</pallas_src>

<mosaic_0001>
module attributes {stable_mosaic.version = 11 : i64} {
  func.func @deconv_kernel(%arg0: i32, %arg1: memref<25x4x4xf32, #tpu.memory_space<vmem>>, %arg2: memref<4x1xf32, #tpu.memory_space<vmem>>, %arg3: memref<1x4x580xf32, #tpu.memory_space<vmem>>, %arg4: memref<1x4x480xf32, #tpu.memory_space<vmem>>) attributes {dimension_semantics = [#tpu.dimension_semantics<parallel>], iteration_bounds = array<i64: 2>, scalar_prefetch = 0 : i64, scratch_operands = 0 : i64, tpu.core_type = #tpu.core_type<tc>, window_params = [{pipeline_mode = #tpu.pipeline_mode<synchronous>, transform_indices = @transform_0, window_bounds = array<i64: 25, 4, 4>}, {pipeline_mode = #tpu.pipeline_mode<synchronous>, transform_indices = @transform_1, window_bounds = array<i64: 4, 1>}, {transform_indices = @transform_2, window_bounds = array<i64: 1, 4, 580>}, {transform_indices = @transform_3, window_bounds = array<i64: 1, 4, 480>}]} {
    %cst = arith.constant 0.000000e+00 : f32
    %0 = vector.broadcast %cst : f32 to vector<4x480xf32>
    %c0 = arith.constant 0 : index
    %c0_0 = arith.constant 0 : index
    %c0_1 = arith.constant 0 : index
    %1 = vector.load %arg1[%c0, %c0_0, %c0_1] : memref<25x4x4xf32, #tpu.memory_space<vmem>>, vector<1x4x4xf32>
    %2 = vector.shape_cast %1 : vector<1x4x4xf32> to vector<4x4xf32>
    %c0_2 = arith.constant 0 : index
    %c0_3 = arith.constant 0 : index
    %c0_4 = arith.constant 0 : index
    %3 = vector.load %arg3[%c0_2, %c0_3, %c0_4] : memref<1x4x580xf32, #tpu.memory_space<vmem>>, vector<1x4x480xf32>
    %4 = vector.shape_cast %3 : vector<1x4x480xf32> to vector<4x480xf32>
    %cst_5 = arith.constant dense<0.000000e+00> : vector<4x480xf32>
    %5 = tpu.matmul %2, %4, %cst_5 {dimension_numbers = #tpu.dot_dimension_numbers<[1], [0], [0], [1], [0, 0, 1, 1], [], []>} : vector<4x4xf32>, vector<4x480xf32>, vector<4x480xf32> -> vector<4x480xf32>
    %6 = arith.addf %0, %5 : vector<4x480xf32>
    %c1 = arith.constant 1 : index
    %c0_6 = arith.constant 0 : index
    %c0_7 = arith.constant 0 : index
    %7 = vector.load %arg1[%c1, %c0_6, %c0_7] : memref<25x4x4xf32, #tpu.memory_space<vmem>>, vector<1x4x4xf32>
    %8 = vector.shape_cast %7 : vector<1x4x4xf32> to vector<4x4xf32>
    %c0_8 = arith.constant 0 : index
    %c0_9 = arith.constant 0 : index
    %c1_10 = arith.constant 1 : index
    %9 = vector.load %arg3[%c0_8, %c0_9, %c1_10] : memref<1x4x580xf32, #tpu.memory_space<vmem>>, vector<1x4x480xf32>
    %10 = vector.shape_cast %9 : vector<1x4x480xf32> to vector<4x480xf32>
    %cst_11 = arith.constant dense<0.000000e+00> : vector<4x480xf32>
    %11 = tpu.matmul %8, %10, %cst_11 {dimension_numbers = #tpu.dot_dimension_numbers<[1], [0], [0], [1], [0, 0, 1, 1], [], []>} : vector<4x4xf32>, vector<4x480xf32>, vector<4x480xf32> -> vector<4x480xf32>
    %12 = arith.addf %6, %11 : vector<4x480xf32>
    %c2 = arith.constant 2 : index
    %c0_12 = arith.constant 0 : index
    %c0_13 = arith.constant 0 : index
    %13 = vector.load %arg1[%c2, %c0_12, %c0_13] : memref<25x4x4xf32, #tpu.memory_space<vmem>>, vector<1x4x4xf32>
    %14 = vector.shape_cast %13 : vector<1x4x4xf32> to vector<4x4xf32>
    %c0_14 = arith.constant 0 : index
    %c0_15 = arith.constant 0 : index
    %c2_16 = arith.constant 2 : index
    %15 = vector.load %arg3[%c0_14, %c0_15, %c2_16] : memref<1x4x580xf32, #tpu.memory_space<vmem>>, vector<1x4x480xf32>
    %16 = vector.shape_cast %15 : vector<1x4x480xf32> to vector<4x480xf32>
    %cst_17 = arith.constant dense<0.000000e+00> : vector<4x480xf32>
    %17 = tpu.matmul %14, %16, %cst_17 {dimension_numbers = #tpu.dot_dimension_numbers<[1], [0], [0], [1], [0, 0, 1, 1], [], []>} : vector<4x4xf32>, vector<4x480xf32>, vector<4x480xf32> -> vector<4x480xf32>
    %18 = arith.addf %12, %17 : vector<4x480xf32>
    %c3 = arith.constant 3 : index
    %c0_18 = arith.constant 0 : index
    %c0_19 = arith.constant 0 : index
    %19 = vector.load %arg1[%c3, %c0_18, %c0_19] : memref<25x4x4xf32, #tpu.memory_space<vmem>>, vector<1x4x4xf32>
    %20 = vector.shape_cast %19 : vector<1x4x4xf32> to vector<4x4xf32>
    %c0_20 = arith.constant 0 : index
    %c0_21 = arith.constant 0 : index
    %c3_22 = arith.constant 3 : index
    %21 = vector.load %arg3[%c0_20, %c0_21, %c3_22] : memref<1x4x580xf32, #tpu.memory_space<vmem>>, vector<1x4x480xf32>
    %22 = vector.shape_cast %21 : vector<1x4x480xf32> to vector<4x480xf32>
    %cst_23 = arith.constant dense<0.000000e+00> : vector<4x480xf32>
    %23 = tpu.matmul %20, %22, %cst_23 {dimension_numbers = #tpu.dot_dimension_numbers<[1], [0], [0], [1], [0, 0, 1, 1], [], []>} : vector<4x4xf32>, vector<4x480xf32>, vector<4x480xf32> -> vector<4x480xf32>
    %24 = arith.addf %18, %23 : vector<4x480xf32>
    %c4 = arith.constant 4 : index
    %c0_24 = arith.constant 0 : index
    %c0_25 = arith.constant 0 : index
    %25 = vector.load %arg1[%c4, %c0_24, %c0_25] : memref<25x4x4xf32, #tpu.memory_space<vmem>>, vector<1x4x4xf32>
    %26 = vector.shape_cast %25 : vector<1x4x4xf32> to vector<4x4xf32>
    %c0_26 = arith.constant 0 : index
    %c0_27 = arith.constant 0 : index
    %c4_28 = arith.constant 4 : index
    %27 = vector.load %arg3[%c0_26, %c0_27, %c4_28] : memref<1x4x580xf32, #tpu.memory_space<vmem>>, vector<1x4x480xf32>
    %28 = vector.shape_cast %27 : vector<1x4x480xf32> to vector<4x480xf32>
    %cst_29 = arith.constant dense<0.000000e+00> : vector<4x480xf32>
    %29 = tpu.matmul %26, %28, %cst_29 {dimension_numbers = #tpu.dot_dimension_numbers<[1], [0], [0], [1], [0, 0, 1, 1], [], []>} : vector<4x4xf32>, vector<4x480xf32>, vector<4x480xf32> -> vector<4x480xf32>
    %30 = arith.addf %24, %29 : vector<4x480xf32>
    %c5 = arith.constant 5 : index
    %c0_30 = arith.constant 0 : index
    %c0_31 = arith.constant 0 : index
    %31 = vector.load %arg1[%c5, %c0_30, %c0_31] : memref<25x4x4xf32, #tpu.memory_space<vmem>>, vector<1x4x4xf32>
    %32 = vector.shape_cast %31 : vector<1x4x4xf32> to vector<4x4xf32>
    %c0_32 = arith.constant 0 : index
    %c0_33 = arith.constant 0 : index
    %c24 = arith.constant 24 : index
    %33 = vector.load %arg3[%c0_32, %c0_33, %c24] : memref<1x4x580xf32, #tpu.memory_space<vmem>>, vector<1x4x480xf32>
    %34 = vector.shape_cast %33 : vector<1x4x480xf32> to vector<4x480xf32>
    %cst_34 = arith.constant dense<0.000000e+00> : vector<4x480xf32>
    %35 = tpu.matmul %32, %34, %cst_34 {dimension_numbers = #tpu.dot_dimension_numbers<[1], [0], [0], [1], [0, 0, 1, 1], [], []>} : vector<4x4xf32>, vector<4x480xf32>, vector<4x480xf32> -> vector<4x480xf32>
    %36 = arith.addf %30, %35 : vector<4x480xf32>
    %c6 = arith.constant 6 : index
    %c0_35 = arith.constant 0 : index
    %c0_36 = arith.constant 0 : index
    %37 = vector.load %arg1[%c6, %c0_35, %c0_36] : memref<25x4x4xf32, #tpu.memory_space<vmem>>, vector<1x4x4xf32>
    %38 = vector.shape_cast %37 : vector<1x4x4xf32> to vector<4x4xf32>
    %c0_37 = arith.constant 0 : index
    %c0_38 = arith.constant 0 : index
    %c25 = arith.constant 25 : index
    %39 = vector.load %arg3[%c0_37, %c0_38, %c25] : memref<1x4x580xf32, #tpu.memory_space<vmem>>, vector<1x4x480xf32>
    %40 = vector.shape_cast %39 : vector<1x4x480xf32> to vector<4x480xf32>
    %cst_39 = arith.constant dense<0.000000e+00> : vector<4x480xf32>
    %41 = tpu.matmul %38, %40, %cst_39 {dimension_numbers = #tpu.dot_dimension_numbers<[1], [0], [0], [1], [0, 0, 1, 1], [], []>} : vector<4x4xf32>, vector<4x480xf32>, vector<4x480xf32> -> vector<4x480xf32>
    %42 = arith.addf %36, %41 : vector<4x480xf32>
    %c7 = arith.constant 7 : index
    %c0_40 = arith.constant 0 : index
    %c0_41 = arith.constant 0 : index
    %43 = vector.load %arg1[%c7, %c0_40, %c0_41] : memref<25x4x4xf32, #tpu.memory_space<vmem>>, vector<1x4x4xf32>
    %44 = vector.shape_cast %43 : vector<1x4x4xf32> to vector<4x4xf32>
    %c0_42 = arith.constant 0 : index
    %c0_43 = arith.constant 0 : index
    %c26 = arith.constant 26 : index
    %45 = vector.load %arg3[%c0_42, %c0_43, %c26] : memref<1x4x580xf32, #tpu.memory_space<vmem>>, vector<1x4x480xf32>
    %46 = vector.shape_cast %45 : vector<1x4x480xf32> to vector<4x480xf32>
    %cst_44 = arith.constant dense<0.000000e+00> : vector<4x480xf32>
    %47 = tpu.matmul %44, %46, %cst_44 {dimension_numbers = #tpu.dot_dimension_numbers<[1], [0], [0], [1], [0, 0, 1, 1], [], []>} : vector<4x4xf32>, vector<4x480xf32>, vector<4x480xf32> -> vector<4x480xf32>
    %48 = arith.addf %42, %47 : vector<4x480xf32>
    %c8 = arith.constant 8 : index
    %c0_45 = arith.constant 0 : index
    %c0_46 = arith.constant 0 : index
    %49 = vector.load %arg1[%c8, %c0_45, %c0_46] : memref<25x4x4xf32, #tpu.memory_space<vmem>>, vector<1x4x4xf32>
    %50 = vector.shape_cast %49 : vector<1x4x4xf32> to vector<4x4xf32>
    %c0_47 = arith.constant 0 : index
    %c0_48 = arith.constant 0 : index
    %c27 = arith.constant 27 : index
    %51 = vector.load %arg3[%c0_47, %c0_48, %c27] : memref<1x4x580xf32, #tpu.memory_space<vmem>>, vector<1x4x480xf32>
    %52 = vector.shape_cast %51 : vector<1x4x480xf32> to vector<4x480xf32>
    %cst_49 = arith.constant dense<0.000000e+00> : vector<4x480xf32>
    %53 = tpu.matmul %50, %52, %cst_49 {dimension_numbers = #tpu.dot_dimension_numbers<[1], [0], [0], [1], [0, 0, 1, 1], [], []>} : vector<4x4xf32>, vector<4x480xf32>, vector<4x480xf32> -> vector<4x480xf32>
    %54 = arith.addf %48, %53 : vector<4x480xf32>
    %c9 = arith.constant 9 : index
    %c0_50 = arith.constant 0 : index
    %c0_51 = arith.constant 0 : index
    %55 = vector.load %arg1[%c9, %c0_50, %c0_51] : memref<25x4x4xf32, #tpu.memory_space<vmem>>, vector<1x4x4xf32>
    %56 = vector.shape_cast %55 : vector<1x4x4xf32> to vector<4x4xf32>
    %c0_52 = arith.constant 0 : index
    %c0_53 = arith.constant 0 : index
    %c28 = arith.constant 28 : index
    %57 = vector.load %arg3[%c0_52, %c0_53, %c28] : memref<1x4x580xf32, #tpu.memory_space<vmem>>, vector<1x4x480xf32>
    %58 = vector.shape_cast %57 : vector<1x4x480xf32> to vector<4x480xf32>
    %cst_54 = arith.constant dense<0.000000e+00> : vector<4x480xf32>
    %59 = tpu.matmul %56, %58, %cst_54 {dimension_numbers = #tpu.dot_dimension_numbers<[1], [0], [0], [1], [0, 0, 1, 1], [], []>} : vector<4x4xf32>, vector<4x480xf32>, vector<4x480xf32> -> vector<4x480xf32>
    %60 = arith.addf %54, %59 : vector<4x480xf32>
    %c10 = arith.constant 10 : index
    %c0_55 = arith.constant 0 : index
    %c0_56 = arith.constant 0 : index
    %61 = vector.load %arg1[%c10, %c0_55, %c0_56] : memref<25x4x4xf32, #tpu.memory_space<vmem>>, vector<1x4x4xf32>
    %62 = vector.shape_cast %61 : vector<1x4x4xf32> to vector<4x4xf32>
    %c0_57 = arith.constant 0 : index
    %c0_58 = arith.constant 0 : index
    %c48 = arith.constant 48 : index
    %63 = vector.load %arg3[%c0_57, %c0_58, %c48] : memref<1x4x580xf32, #tpu.memory_space<vmem>>, vector<1x4x480xf32>
    %64 = vector.shape_cast %63 : vector<1x4x480xf32> to vector<4x480xf32>
    %cst_59 = arith.constant dense<0.000000e+00> : vector<4x480xf32>
    %65 = tpu.matmul %62, %64, %cst_59 {dimension_numbers = #tpu.dot_dimension_numbers<[1], [0], [0], [1], [0, 0, 1, 1], [], []>} : vector<4x4xf32>, vector<4x480xf32>, vector<4x480xf32> -> vector<4x480xf32>
    %66 = arith.addf %60, %65 : vector<4x480xf32>
    %c11 = arith.constant 11 : index
    %c0_60 = arith.constant 0 : index
    %c0_61 = arith.constant 0 : index
    %67 = vector.load %arg1[%c11, %c0_60, %c0_61] : memref<25x4x4xf32, #tpu.memory_space<vmem>>, vector<1x4x4xf32>
    %68 = vector.shape_cast %67 : vector<1x4x4xf32> to vector<4x4xf32>
    %c0_62 = arith.constant 0 : index
    %c0_63 = arith.constant 0 : index
    %c49 = arith.constant 49 : index
    %69 = vector.load %arg3[%c0_62, %c0_63, %c49] : memref<1x4x580xf32, #tpu.memory_space<vmem>>, vector<1x4x480xf32>
    %70 = vector.shape_cast %69 : vector<1x4x480xf32> to vector<4x480xf32>
    %cst_64 = arith.constant dense<0.000000e+00> : vector<4x480xf32>
    %71 = tpu.matmul %68, %70, %cst_64 {dimension_numbers = #tpu.dot_dimension_numbers<[1], [0], [0], [1], [0, 0, 1, 1], [], []>} : vector<4x4xf32>, vector<4x480xf32>, vector<4x480xf32> -> vector<4x480xf32>
    %72 = arith.addf %66, %71 : vector<4x480xf32>
    %c12 = arith.constant 12 : index
    %c0_65 = arith.constant 0 : index
    %c0_66 = arith.constant 0 : index
    %73 = vector.load %arg1[%c12, %c0_65, %c0_66] : memref<25x4x4xf32, #tpu.memory_space<vmem>>, vector<1x4x4xf32>
    %74 = vector.shape_cast %73 : vector<1x4x4xf32> to vector<4x4xf32>
    %c0_67 = arith.constant 0 : index
    %c0_68 = arith.constant 0 : index
    %c50 = arith.constant 50 : index
    %75 = vector.load %arg3[%c0_67, %c0_68, %c50] : memref<1x4x580xf32, #tpu.memory_space<vmem>>, vector<1x4x480xf32>
    %76 = vector.shape_cast %75 : vector<1x4x480xf32> to vector<4x480xf32>
    %cst_69 = arith.constant dense<0.000000e+00> : vector<4x480xf32>
    %77 = tpu.matmul %74, %76, %cst_69 {dimension_numbers = #tpu.dot_dimension_numbers<[1], [0], [0], [1], [0, 0, 1, 1], [], []>} : vector<4x4xf32>, vector<4x480xf32>, vector<4x480xf32> -> vector<4x480xf32>
    %78 = arith.addf %72, %77 : vector<4x480xf32>
    %c13 = arith.constant 13 : index
    %c0_70 = arith.constant 0 : index
    %c0_71 = arith.constant 0 : index
    %79 = vector.load %arg1[%c13, %c0_70, %c0_71] : memref<25x4x4xf32, #tpu.memory_space<vmem>>, vector<1x4x4xf32>
    %80 = vector.shape_cast %79 : vector<1x4x4xf32> to vector<4x4xf32>
    %c0_72 = arith.constant 0 : index
    %c0_73 = arith.constant 0 : index
    %c51 = arith.constant 51 : index
    %81 = vector.load %arg3[%c0_72, %c0_73, %c51] : memref<1x4x580xf32, #tpu.memory_space<vmem>>, vector<1x4x480xf32>
    %82 = vector.shape_cast %81 : vector<1x4x480xf32> to vector<4x480xf32>
    %cst_74 = arith.constant dense<0.000000e+00> : vector<4x480xf32>
    %83 = tpu.matmul %80, %82, %cst_74 {dimension_numbers = #tpu.dot_dimension_numbers<[1], [0], [0], [1], [0, 0, 1, 1], [], []>} : vector<4x4xf32>, vector<4x480xf32>, vector<4x480xf32> -> vector<4x480xf32>
    %84 = arith.addf %78, %83 : vector<4x480xf32>
    %c14 = arith.constant 14 : index
    %c0_75 = arith.constant 0 : index
    %c0_76 = arith.constant 0 : index
    %85 = vector.load %arg1[%c14, %c0_75, %c0_76] : memref<25x4x4xf32, #tpu.memory_space<vmem>>, vector<1x4x4xf32>
    %86 = vector.shape_cast %85 : vector<1x4x4xf32> to vector<4x4xf32>
    %c0_77 = arith.constant 0 : index
    %c0_78 = arith.constant 0 : index
    %c52 = arith.constant 52 : index
    %87 = vector.load %arg3[%c0_77, %c0_78, %c52] : memref<1x4x580xf32, #tpu.memory_space<vmem>>, vector<1x4x480xf32>
    %88 = vector.shape_cast %87 : vector<1x4x480xf32> to vector<4x480xf32>
    %cst_79 = arith.constant dense<0.000000e+00> : vector<4x480xf32>
    %89 = tpu.matmul %86, %88, %cst_79 {dimension_numbers = #tpu.dot_dimension_numbers<[1], [0], [0], [1], [0, 0, 1, 1], [], []>} : vector<4x4xf32>, vector<4x480xf32>, vector<4x480xf32> -> vector<4x480xf32>
    %90 = arith.addf %84, %89 : vector<4x480xf32>
    %c15 = arith.constant 15 : index
    %c0_80 = arith.constant 0 : index
    %c0_81 = arith.constant 0 : index
    %91 = vector.load %arg1[%c15, %c0_80, %c0_81] : memref<25x4x4xf32, #tpu.memory_space<vmem>>, vector<1x4x4xf32>
    %92 = vector.shape_cast %91 : vector<1x4x4xf32> to vector<4x4xf32>
    %c0_82 = arith.constant 0 : index
    %c0_83 = arith.constant 0 : index
    %c72 = arith.constant 72 : index
    %93 = vector.load %arg3[%c0_82, %c0_83, %c72] : memref<1x4x580xf32, #tpu.memory_space<vmem>>, vector<1x4x480xf32>
    %94 = vector.shape_cast %93 : vector<1x4x480xf32> to vector<4x480xf32>
    %cst_84 = arith.constant dense<0.000000e+00> : vector<4x480xf32>
    %95 = tpu.matmul %92, %94, %cst_84 {dimension_numbers = #tpu.dot_dimension_numbers<[1], [0], [0], [1], [0, 0, 1, 1], [], []>} : vector<4x4xf32>, vector<4x480xf32>, vector<4x480xf32> -> vector<4x480xf32>
    %96 = arith.addf %90, %95 : vector<4x480xf32>
    %c16 = arith.constant 16 : index
    %c0_85 = arith.constant 0 : index
    %c0_86 = arith.constant 0 : index
    %97 = vector.load %arg1[%c16, %c0_85, %c0_86] : memref<25x4x4xf32, #tpu.memory_space<vmem>>, vector<1x4x4xf32>
    %98 = vector.shape_cast %97 : vector<1x4x4xf32> to vector<4x4xf32>
    %c0_87 = arith.constant 0 : index
    %c0_88 = arith.constant 0 : index
    %c73 = arith.constant 73 : index
    %99 = vector.load %arg3[%c0_87, %c0_88, %c73] : memref<1x4x580xf32, #tpu.memory_space<vmem>>, vector<1x4x480xf32>
    %100 = vector.shape_cast %99 : vector<1x4x480xf32> to vector<4x480xf32>
    %cst_89 = arith.constant dense<0.000000e+00> : vector<4x480xf32>
    %101 = tpu.matmul %98, %100, %cst_89 {dimension_numbers = #tpu.dot_dimension_numbers<[1], [0], [0], [1], [0, 0, 1, 1], [], []>} : vector<4x4xf32>, vector<4x480xf32>, vector<4x480xf32> -> vector<4x480xf32>
    %102 = arith.addf %96, %101 : vector<4x480xf32>
    %c17 = arith.constant 17 : index
    %c0_90 = arith.constant 0 : index
    %c0_91 = arith.constant 0 : index
    %103 = vector.load %arg1[%c17, %c0_90, %c0_91] : memref<25x4x4xf32, #tpu.memory_space<vmem>>, vector<1x4x4xf32>
    %104 = vector.shape_cast %103 : vector<1x4x4xf32> to vector<4x4xf32>
    %c0_92 = arith.constant 0 : index
    %c0_93 = arith.constant 0 : index
    %c74 = arith.constant 74 : index
    %105 = vector.load %arg3[%c0_92, %c0_93, %c74] : memref<1x4x580xf32, #tpu.memory_space<vmem>>, vector<1x4x480xf32>
    %106 = vector.shape_cast %105 : vector<1x4x480xf32> to vector<4x480xf32>
    %cst_94 = arith.constant dense<0.000000e+00> : vector<4x480xf32>
    %107 = tpu.matmul %104, %106, %cst_94 {dimension_numbers = #tpu.dot_dimension_numbers<[1], [0], [0], [1], [0, 0, 1, 1], [], []>} : vector<4x4xf32>, vector<4x480xf32>, vector<4x480xf32> -> vector<4x480xf32>
    %108 = arith.addf %102, %107 : vector<4x480xf32>
    %c18 = arith.constant 18 : index
    %c0_95 = arith.constant 0 : index
    %c0_96 = arith.constant 0 : index
    %109 = vector.load %arg1[%c18, %c0_95, %c0_96] : memref<25x4x4xf32, #tpu.memory_space<vmem>>, vector<1x4x4xf32>
    %110 = vector.shape_cast %109 : vector<1x4x4xf32> to vector<4x4xf32>
    %c0_97 = arith.constant 0 : index
    %c0_98 = arith.constant 0 : index
    %c75 = arith.constant 75 : index
    %111 = vector.load %arg3[%c0_97, %c0_98, %c75] : memref<1x4x580xf32, #tpu.memory_space<vmem>>, vector<1x4x480xf32>
    %112 = vector.shape_cast %111 : vector<1x4x480xf32> to vector<4x480xf32>
    %cst_99 = arith.constant dense<0.000000e+00> : vector<4x480xf32>
    %113 = tpu.matmul %110, %112, %cst_99 {dimension_numbers = #tpu.dot_dimension_numbers<[1], [0], [0], [1], [0, 0, 1, 1], [], []>} : vector<4x4xf32>, vector<4x480xf32>, vector<4x480xf32> -> vector<4x480xf32>
    %114 = arith.addf %108, %113 : vector<4x480xf32>
    %c19 = arith.constant 19 : index
    %c0_100 = arith.constant 0 : index
    %c0_101 = arith.constant 0 : index
    %115 = vector.load %arg1[%c19, %c0_100, %c0_101] : memref<25x4x4xf32, #tpu.memory_space<vmem>>, vector<1x4x4xf32>
    %116 = vector.shape_cast %115 : vector<1x4x4xf32> to vector<4x4xf32>
    %c0_102 = arith.constant 0 : index
    %c0_103 = arith.constant 0 : index
    %c76 = arith.constant 76 : index
    %117 = vector.load %arg3[%c0_102, %c0_103, %c76] : memref<1x4x580xf32, #tpu.memory_space<vmem>>, vector<1x4x480xf32>
    %118 = vector.shape_cast %117 : vector<1x4x480xf32> to vector<4x480xf32>
    %cst_104 = arith.constant dense<0.000000e+00> : vector<4x480xf32>
    %119 = tpu.matmul %116, %118, %cst_104 {dimension_numbers = #tpu.dot_dimension_numbers<[1], [0], [0], [1], [0, 0, 1, 1], [], []>} : vector<4x4xf32>, vector<4x480xf32>, vector<4x480xf32> -> vector<4x480xf32>
    %120 = arith.addf %114, %119 : vector<4x480xf32>
    %c20 = arith.constant 20 : index
    %c0_105 = arith.constant 0 : index
    %c0_106 = arith.constant 0 : index
    %121 = vector.load %arg1[%c20, %c0_105, %c0_106] : memref<25x4x4xf32, #tpu.memory_space<vmem>>, vector<1x4x4xf32>
    %122 = vector.shape_cast %121 : vector<1x4x4xf32> to vector<4x4xf32>
    %c0_107 = arith.constant 0 : index
    %c0_108 = arith.constant 0 : index
    %c96 = arith.constant 96 : index
    %123 = vector.load %arg3[%c0_107, %c0_108, %c96] : memref<1x4x580xf32, #tpu.memory_space<vmem>>, vector<1x4x480xf32>
    %124 = vector.shape_cast %123 : vector<1x4x480xf32> to vector<4x480xf32>
    %cst_109 = arith.constant dense<0.000000e+00> : vector<4x480xf32>
    %125 = tpu.matmul %122, %124, %cst_109 {dimension_numbers = #tpu.dot_dimension_numbers<[1], [0], [0], [1], [0, 0, 1, 1], [], []>} : vector<4x4xf32>, vector<4x480xf32>, vector<4x480xf32> -> vector<4x480xf32>
    %126 = arith.addf %120, %125 : vector<4x480xf32>
    %c21 = arith.constant 21 : index
    %c0_110 = arith.constant 0 : index
    %c0_111 = arith.constant 0 : index
    %127 = vector.load %arg1[%c21, %c0_110, %c0_111] : memref<25x4x4xf32, #tpu.memory_space<vmem>>, vector<1x4x4xf32>
    %128 = vector.shape_cast %127 : vector<1x4x4xf32> to vector<4x4xf32>
    %c0_112 = arith.constant 0 : index
    %c0_113 = arith.constant 0 : index
    %c97 = arith.constant 97 : index
    %129 = vector.load %arg3[%c0_112, %c0_113, %c97] : memref<1x4x580xf32, #tpu.memory_space<vmem>>, vector<1x4x480xf32>
    %130 = vector.shape_cast %129 : vector<1x4x480xf32> to vector<4x480xf32>
    %cst_114 = arith.constant dense<0.000000e+00> : vector<4x480xf32>
    %131 = tpu.matmul %128, %130, %cst_114 {dimension_numbers = #tpu.dot_dimension_numbers<[1], [0], [0], [1], [0, 0, 1, 1], [], []>} : vector<4x4xf32>, vector<4x480xf32>, vector<4x480xf32> -> vector<4x480xf32>
    %132 = arith.addf %126, %131 : vector<4x480xf32>
    %c22 = arith.constant 22 : index
    %c0_115 = arith.constant 0 : index
    %c0_116 = arith.constant 0 : index
    %133 = vector.load %arg1[%c22, %c0_115, %c0_116] : memref<25x4x4xf32, #tpu.memory_space<vmem>>, vector<1x4x4xf32>
    %134 = vector.shape_cast %133 : vector<1x4x4xf32> to vector<4x4xf32>
    %c0_117 = arith.constant 0 : index
    %c0_118 = arith.constant 0 : index
    %c98 = arith.constant 98 : index
    %135 = vector.load %arg3[%c0_117, %c0_118, %c98] : memref<1x4x580xf32, #tpu.memory_space<vmem>>, vector<1x4x480xf32>
    %136 = vector.shape_cast %135 : vector<1x4x480xf32> to vector<4x480xf32>
    %cst_119 = arith.constant dense<0.000000e+00> : vector<4x480xf32>
    %137 = tpu.matmul %134, %136, %cst_119 {dimension_numbers = #tpu.dot_dimension_numbers<[1], [0], [0], [1], [0, 0, 1, 1], [], []>} : vector<4x4xf32>, vector<4x480xf32>, vector<4x480xf32> -> vector<4x480xf32>
    %138 = arith.addf %132, %137 : vector<4x480xf32>
    %c23 = arith.constant 23 : index
    %c0_120 = arith.constant 0 : index
    %c0_121 = arith.constant 0 : index
    %139 = vector.load %arg1[%c23, %c0_120, %c0_121] : memref<25x4x4xf32, #tpu.memory_space<vmem>>, vector<1x4x4xf32>
    %140 = vector.shape_cast %139 : vector<1x4x4xf32> to vector<4x4xf32>
    %c0_122 = arith.constant 0 : index
    %c0_123 = arith.constant 0 : index
    %c99 = arith.constant 99 : index
    %141 = vector.load %arg3[%c0_122, %c0_123, %c99] : memref<1x4x580xf32, #tpu.memory_space<vmem>>, vector<1x4x480xf32>
    %142 = vector.shape_cast %141 : vector<1x4x480xf32> to vector<4x480xf32>
    %cst_124 = arith.constant dense<0.000000e+00> : vector<4x480xf32>
    %143 = tpu.matmul %140, %142, %cst_124 {dimension_numbers = #tpu.dot_dimension_numbers<[1], [0], [0], [1], [0, 0, 1, 1], [], []>} : vector<4x4xf32>, vector<4x480xf32>, vector<4x480xf32> -> vector<4x480xf32>
    %144 = arith.addf %138, %143 : vector<4x480xf32>
    %c24_125 = arith.constant 24 : index
    %c0_126 = arith.constant 0 : index
    %c0_127 = arith.constant 0 : index
    %145 = vector.load %arg1[%c24_125, %c0_126, %c0_127] : memref<25x4x4xf32, #tpu.memory_space<vmem>>, vector<1x4x4xf32>
    %146 = vector.shape_cast %145 : vector<1x4x4xf32> to vector<4x4xf32>
    %c0_128 = arith.constant 0 : index
    %c0_129 = arith.constant 0 : index
    %c100 = arith.constant 100 : index
    %147 = vector.load %arg3[%c0_128, %c0_129, %c100] : memref<1x4x580xf32, #tpu.memory_space<vmem>>, vector<1x4x480xf32>
    %148 = vector.shape_cast %147 : vector<1x4x480xf32> to vector<4x480xf32>
    %cst_130 = arith.constant dense<0.000000e+00> : vector<4x480xf32>
    %149 = tpu.matmul %146, %148, %cst_130 {dimension_numbers = #tpu.dot_dimension_numbers<[1], [0], [0], [1], [0, 0, 1, 1], [], []>} : vector<4x4xf32>, vector<4x480xf32>, vector<4x480xf32> -> vector<4x480xf32>
    %150 = arith.addf %144, %149 : vector<4x480xf32>
    %c0_131 = arith.constant 0 : index
    %c0_132 = arith.constant 0 : index
    %151 = vector.load %arg2[%c0_131, %c0_132] : memref<4x1xf32, #tpu.memory_space<vmem>>, vector<4x1xf32>
    %152 = vector.broadcast %151 : vector<4x1xf32> to vector<4x480xf32>
    %153 = arith.addf %150, %152 : vector<4x480xf32>
    %cst_133 = arith.constant 0.000000e+00 : f32
    %154 = vector.broadcast %cst_133 : f32 to vector<4x480xf32>
    %155 = arith.maximumf %153, %154 : vector<4x480xf32>
    %c0_134 = arith.constant 0 : index
    %c0_135 = arith.constant 0 : index
    %c0_136 = arith.constant 0 : index
    %156 = vector.load %arg4[%c0_134, %c0_135, %c0_136] : memref<1x4x480xf32, #tpu.memory_space<vmem>>, vector<1x4x480xf32>
    %157 = vector.shape_cast %156 : vector<1x4x480xf32> to vector<4x480xf32>
    %158 = vector.shape_cast %155 : vector<4x480xf32> to vector<1x4x480xf32>
    tpu.vector_store %arg4[%c0_134, %c0_135, %c0_136], %158 {strides = array<i32>} : memref<1x4x480xf32, #tpu.memory_space<vmem>>, vector<1x4x480xf32>,
    return
  }
  func.func @transform_0(%arg0: i32) -> (i32, i32, i32) {
    %c0_i32 = arith.constant 0 : i32
    %c0_i32_0 = arith.constant 0 : i32
    %c0_i32_1 = arith.constant 0 : i32
    %c0_i32_2 = arith.constant 0 : i32
    return %c0_i32, %c0_i32_0, %c0_i32_1 : i32, i32, i32
  }
  func.func @transform_1(%arg0: i32) -> (i32, i32) {
    %c0_i32 = arith.constant 0 : i32
    %c0_i32_0 = arith.constant 0 : i32
    %c0_i32_1 = arith.constant 0 : i32
    return %c0_i32, %c0_i32_0 : i32, i32
  }
  func.func @transform_2(%arg0: i32) -> (i32, i32, i32) {
    %c0_i32 = arith.constant 0 : i32
    %c0_i32_0 = arith.constant 0 : i32
    %c0_i32_1 = arith.constant 0 : i32
    return %arg0, %c0_i32, %c0_i32_0 : i32, i32, i32
  }
  func.func @transform_3(%arg0: i32) -> (i32, i32, i32) {
    %c0_i32 = arith.constant 0 : i32
    %c0_i32_0 = arith.constant 0 : i32
    %c0_i32_1 = arith.constant 0 : i32
    return %arg0, %c0_i32, %c0_i32_0 : i32, i32, i32
  }
}

</mosaic_0001>

<bundles_post_ra>
// kernel: tpu_custom_call.1
= control target key start
LH: loop header
LB: loop body
LE: loop exit
PB: predicated region body
PF: predicated region fallthrough
CT: control target
= control target key end

     0   :  { %8 = vsyncpa [#allocation3], 0  ;;  %s5789_s0 = inlined_call_operand.vmem [shape: f32[25,4,4], index: 0, kind: input, shape index: {}]   ;;  %s5790_s1 = inlined_call_operand.vmem [shape: f32[4,1], index: 1, kind: input, shape index: {}]   ;;  %s5791_s2 = inlined_call_operand.vmem [shape: f32[2,4,580], index: 2, kind: input, shape index: {}]   ;;  %s5792_s3 = inlined_call_operand.hbm [shape: f32[2,4,480], index: 3, kind: output, shape index: {}]  }
   0x1   :  { %10 = vsyncpa [#allocation3 + $0x1], 0  ;;  %s5207_s12 = smov 0   ;;  %s5209_s13 = smov 0  }
   0x2   :  { %s5211_s14 = smov 0   ;;  %s5213_s15 = smov 0  }
   0x3 LB: > { %s5228_s16 = sadd.s32 4294967295, %s5158_s15   ;;  %s4744_s17 = sadd.s32 4294967294, %s5158_s15   ;;  %s5158_s15 = sphi %s5213_s15, %s5798_s15   ;;  %s5154_s14 = sphi %s5211_s14, %s5797_s14   ;;  %s5150_s13 = sphi %s5209_s13, %s5796_s13   ;;  %s5146_s12 = sphi %s5207_s12, %s5795_s12  }
   0x4   : > { %s5232_s18 = sadd.s32 1, %s5158_s15   ;;  %s91_s19 = sadd.s32 1, %s5154_s14 }
   0x5   : > { %s88_s20 = ssub.s32 %s5158_s15, %s5232_s18  ;;  %p101_p0 = scmp.ne.s32.totalorder %s5154_s14, %s5150_s13 }
   0x6   : > { %p89_p1 = scmp.eq.s32.totalorder %s88_s20, 0  ;;  %p102_p2 = scmp.eq.s32.totalorder %s5228_s16, 1 }
   0x7   : > { %p107_p3 = scmp.ne.s32.totalorder %s5150_s13, %s5146_s12  ;;  %p108_p4 = scmp.eq.s32.totalorder %s4744_s17, 1 }
   0x8   : > { %s5243_s21 = scalar_select %p89_p1, %s5154_s14, %s91_s19  }
   0x9   : > { %p5245_p5 = por %p102_p2, %p101_p0  ;;  %p5249_p6 = por %p108_p4, %p107_p3 }
   0xa   : > { %p4747_p7 = scmp.ge.s32.totalorder %s5158_s15, 1  ;;  %p140_p8 = scmp.lt.s32.totalorder %s5158_s15, 3 }
   0xc   : > { %p141_p9 = pnand %p4747_p7, %p140_p8 }
   0xd   : > { %p164_p10 = scmp.lt.s32.totalorder (!%p141_p9), %s5228_s16, 1  ;;  %v5160_v0 = vmov (!%p141_p9), 0.0   ;;  %s5161_s29 = smov (!%p141_p9), 127   ;;  %vm186_vm0 = vcmask (!%p141_p9), 1039360   ;;  %vm194_vm1 = vcmask (!%p141_p9), 1043456   ;;  %vm190_vm2 = vcmask (!%p141_p9), 31744  }
   0xe   : > { %144 = sbr.rel (%p141_p9) target bundleno = 599 (0x257), region = 32  ;;  %267 = vmatprep.mubr.f32.mxu0 (!%p141_p9), %v5160_v0  ;;  %338 = vmatprep.mubr.f32.mxu1 (!%p141_p9), %v5160_v0  ;;  %s5162_s30 = smov (!%p141_p9), 126   ;;  %v4750_v16 = vld [vmem:[%s5789_s0 + $0x4] sm:$0xf] (!%p141_p9)  ;;  %vm514_vm3 = vcmask (!%p141_p9), 1031168   ;;  %vm691_vm4 = vcmask (!%p141_p9), 1022976  }
   0xf   : > { %s5163_s4 = smov (!%p141_p9), 125   ;;  %s5164_s5 = smov (!%p141_p9), 124   ;;  %v169_v24 = vld [vmem:[%s5789_s0] sm:$0xf] (!%p141_p9)  ;;  %v4763_v33 = vld [vmem:[%s5789_s0 + $0x8] sm:$0xf] (!%p141_p9) }
  0x10   : > { %s5165_s6 = smov (!%p141_p9), 104   ;;  %s5166_s7 = smov (!%p141_p9), 103   ;;  %vm868_vm5 = vcmask (!%p141_p9), 1014784   ;;  %v4770_v41 = vld [vmem:[%s5789_s0 + $0xc] sm:$0xf] (!%p141_p9)  ;;  %vm1045_vm6 = vcmask (!%p141_p9), 850944  }
  0x11   : > { %s5167_s8 = smov (!%p141_p9), 102   ;;  %s5168_s9 = smov (!%p141_p9), 101   ;;  %v4777_v50 = vld [vmem:[%s5789_s0 + $0x10] sm:$0xf] (!%p141_p9)  ;;  %vm1222_vm7 = vcmask (!%p141_p9), 842752   ;;  %vm1399_vm8 = vcmask (!%p141_p9), 834560  }
  0x12   : > { %s5169_s10 = smov (!%p141_p9), 100   ;;  %s5170_s11 = smov (!%p141_p9), 80   ;;  %v4784_v59 = vld [vmem:[%s5789_s0 + $0x14] sm:$0xf] (!%p141_p9)  ;;  %vm1576_vm9 = vcmask (!%p141_p9), 826368   ;;  %vm1753_vm10 = vcmask (!%p141_p9), 818176  }
  0x13   : > { %s5171_s17 = smov (!%p141_p9), 79   ;;  %s5172_s19 = smov (!%p141_p9), 78   ;;  %vm1934_vm11 = vcmask (!%p141_p9), 654336   ;;  %vm2116_vm12 = vcmask (!%p141_p9), 646144   ;;  %vm2298_vm13 = vcmask (!%p141_p9), 637952   ;;  %vm2480_vm14 = vcmask (!%p141_p9), 629760  }
  0x14   : > { %s5173_s20 = smov (!%p141_p9), 77   ;;  %s5180_s27 = smov (!%p141_p9), 32   ;;  %vm2662_vm15 = vcmask (!%p141_p9), 621568  }
  0x15   : > { %s165_s24 = scalar_select %p164_p10, %s5228_s16, 1 }
  0x17   : > { %s5026_s25 = smul.u32 20, %s165_s24  ;;  %s5174_s24 = smov 76  }
  0x19   : > { %s5262_s28 = scalar_lea.vmem %s5791_s2, %s5026_s25  ;;  %s5175_s25 = smov 56  }
  0x1a   : > { %v5265_v1 = vld [vmem:[%s5262_s28 + $0x8] sm:$0xff]  ;;  %v5268_v2 = vld [vmem:[%s5262_s28] sm:$0xff]  ;;  %v1918_v5 = vld [vmem:[%s5262_s28 + $0x10] sm:$0xf] }
  0x1b   : > { %182 = vrot.lane.b32.xlu0 %v5265_v1, %s5161_s29  ;;  %178 = vrot.lane.b32.xlu1 %v5268_v2, %s5161_s29  ;;  %v5274_v3 = vcombine.high %v5268_v2, %v5268_v2  ;;  %v5278_v4 = vcombine.high %v5265_v1, %v5265_v1  ;;  %v2100_v6 = vld [vmem:[%s5262_s28 + $0x10] sm:$0xf] }
  0x1c   : > { %v2282_v7 = vld [vmem:[%s5262_s28 + $0x10] sm:$0xf] }
  0x1d   : > { %v2464_v8 = vld [vmem:[%s5262_s28 + $0x10] sm:$0xf] }
  0x1e   : > { %v2646_v9 = vld [vmem:[%s5262_s28 + $0x10] sm:$0xf] }
  0x1f   : > { %510 = vrot.lane.b32.xlu1 %v5265_v1, %s5162_s30  ;;  %180 = vrot.lane.b32.xlu0 %v5274_v3, %s5161_s29  ;;  %v2828_v23 = vld [vmem:[%s5262_s28 + $0x10] sm:$0xf] }
  0x20   : > { %v3010_v31 = vld [vmem:[%s5262_s28 + $0x10] sm:$0xf] }
  0x21   : > { %v3192_v46 = vld [vmem:[%s5262_s28 + $0x10] sm:$0xf] }
  0x22   : > { %v3374_v53 = vld [vmem:[%s5262_s28 + $0x10] sm:$0xf] }
  0x23   : > { %184 = vrot.lane.b32.xlu1 %v5278_v4, %s5161_s29  ;;  %508 = vrot.lane.b32.xlu0 %v5274_v3, %s5162_s30 }
  0x27   : > { %512 = vrot.lane.b32.xlu1 %v5278_v4, %s5162_s30  ;;  %506 = vrot.lane.b32.xlu0 %v5268_v2, %s5162_s30 }
  0x2b   : > { %687 = vrot.lane.b32.xlu1 %v5265_v1, %s5163_s4  ;;  %685 = vrot.lane.b32.xlu0 %v5274_v3, %s5163_s4 }
  0x2f   : > { %689 = vrot.lane.b32.xlu1 %v5278_v4, %s5163_s4  ;;  %683 = vrot.lane.b32.xlu0 %v5268_v2, %s5163_s4  ;;  %s5176_s4 = smov 55  }
  0x33   : > { %864 = vrot.lane.b32.xlu1 %v5265_v1, %s5164_s5  ;;  %862 = vrot.lane.b32.xlu0 %v5274_v3, %s5164_s5 }
  0x37   : > { %866 = vrot.lane.b32.xlu1 %v5278_v4, %s5164_s5  ;;  %860 = vrot.lane.b32.xlu0 %v5268_v2, %s5164_s5 }
  0x3b   : > { %1041 = vrot.lane.b32.xlu1 %v5265_v1, %s5165_s6  ;;  %1039 = vrot.lane.b32.xlu0 %v5274_v3, %s5165_s6 }
  0x3f   : > { %1043 = vrot.lane.b32.xlu1 %v5278_v4, %s5165_s6  ;;  %1037 = vrot.lane.b32.xlu0 %v5268_v2, %s5165_s6 }
  0x43   : > { %1218 = vrot.lane.b32.xlu1 %v5265_v1, %s5166_s7  ;;  %1216 = vrot.lane.b32.xlu0 %v5274_v3, %s5166_s7 }
  0x47   : > { %1220 = vrot.lane.b32.xlu1 %v5278_v4, %s5166_s7  ;;  %1214 = vrot.lane.b32.xlu0 %v5268_v2, %s5166_s7  ;;  %s5177_s7 = smov 54  }
  0x4b   : > { %1395 = vrot.lane.b32.xlu1 %v5265_v1, %s5167_s8  ;;  %1393 = vrot.lane.b32.xlu0 %v5274_v3, %s5167_s8 }
  0x4f   : > { %1397 = vrot.lane.b32.xlu1 %v5278_v4, %s5167_s8  ;;  %1391 = vrot.lane.b32.xlu0 %v5268_v2, %s5167_s8  ;;  %s161_s8 = sand.u32 1, %s5150_s13  }
  0x53   : > { %1572 = vrot.lane.b32.xlu1 %v5265_v1, %s5168_s9  ;;  %1570 = vrot.lane.b32.xlu0 %v5274_v3, %s5168_s9 }
  0x57   : > { %1574 = vrot.lane.b32.xlu1 %v5278_v4, %s5168_s9  ;;  %1568 = vrot.lane.b32.xlu0 %v5268_v2, %s5168_s9  ;;  %s5182_s9 = smov 30  }
  0x5b   : > { %1749 = vrot.lane.b32.xlu1 %v5265_v1, %s5169_s10  ;;  %1747 = vrot.lane.b32.xlu0 %v5274_v3, %s5169_s10 }
  0x5f   : > { %1751 = vrot.lane.b32.xlu1 %v5278_v4, %s5169_s10  ;;  %1745 = vrot.lane.b32.xlu0 %v5268_v2, %s5169_s10  ;;  %s4929_s10 = sshll.u32 %s5228_s16, 8  ;;  %s5186_s16 = smov [#allocation2]  }
  0x63   : > { %1928 = vrot.lane.b32.xlu1 %v5265_v1, %s5170_s11  ;;  %1926 = vrot.lane.b32.xlu0 %v5274_v3, %s5170_s11 }
  0x67   : > { %1932 = vrot.lane.b32.xlu1 %v1918_v5, %s5170_s11  ;;  %1930 = vrot.lane.b32.xlu0 %v5278_v4, %s5170_s11 }
  0x6b   : > { %2108 = vrot.lane.b32.xlu1 %v5274_v3, %s5171_s17  ;;  %1924 = vrot.lane.b32.xlu0 %v5268_v2, %s5170_s11 }
  0x6f   : > { %2112 = vrot.lane.b32.xlu1 %v5278_v4, %s5171_s17  ;;  %2110 = vrot.lane.b32.xlu0 %v5265_v1, %s5171_s17 }
  0x73   : > { %2106 = vrot.lane.b32.xlu1 %v5268_v2, %s5171_s17  ;;  %2114 = vrot.lane.b32.xlu0 %v2100_v6, %s5171_s17  ;;  %s5178_s17 = smov 53  }
  0x77   : > { %2292 = vrot.lane.b32.xlu1 %v5265_v1, %s5172_s19  ;;  %2290 = vrot.lane.b32.xlu0 %v5274_v3, %s5172_s19 }
  0x7b   : > { %2296 = vrot.lane.b32.xlu1 %v2282_v7, %s5172_s19  ;;  %2294 = vrot.lane.b32.xlu0 %v5278_v4, %s5172_s19 }
  0x7f   : > { %2472 = vrot.lane.b32.xlu1 %v5274_v3, %s5173_s20  ;;  %2288 = vrot.lane.b32.xlu0 %v5268_v2, %s5172_s19 }
  0x83   : > { %2476 = vrot.lane.b32.xlu1 %v5278_v4, %s5173_s20  ;;  %2474 = vrot.lane.b32.xlu0 %v5265_v1, %s5173_s20 }
  0x87   : > { %2470 = vrot.lane.b32.xlu1 %v5268_v2, %s5173_s20  ;;  %2478 = vrot.lane.b32.xlu0 %v2464_v8, %s5173_s20  ;;  %v3556_v8 = vld [vmem:[%s5262_s28 + $0x10] sm:$0xf] }
  0x8b   : > { %2656 = vrot.lane.b32.xlu1 %v5265_v1, %s5174_s24  ;;  %2654 = vrot.lane.b32.xlu0 %v5274_v3, %s5174_s24 }
  0x8d   : > { %v183_v10 = vpop.permute.xlu0 %182  ;;  %v179_v11 = vpop.permute.xlu1 %178 }
  0x8f   : > { %2660 = vrot.lane.b32.xlu1 %v2646_v9, %s5174_s24  ;;  %2658 = vrot.lane.b32.xlu0 %v5278_v4, %s5174_s24  ;;  %v4791_v9 = vld [vmem:[%s5789_s0 + $0x18] sm:$0xf] }
  0x91   : > { %v511_v12 = vpop.permute.xlu1 %510  ;;  %v181_v13 = vpop.permute.xlu0 %180 }
  0x92   : > { %v188_v14 = vsel %vm186_vm0, %v181_v13, %v183_v10  ;;  %v187_v15 = vsel %vm186_vm0, %v179_v11, %v181_v13 }
  0x93   : > { %2836 = vrot.lane.b32.xlu1 %v5274_v3, %s5175_s25  ;;  %2652 = vrot.lane.b32.xlu0 %v5268_v2, %s5174_s24  ;;  %s5179_s24 = smov 52  }
  0x94   : > { %4751 = vmatprep.subr.msk.mxu0 %vm194_vm1, %v188_v14 }
  0x95   : > { %4752 = vmatpush1.msk.msra.mxu0 %vm194_vm1, %v187_v15  ;;  %v185_v17 = vpop.permute.xlu1 %184  ;;  %v509_v18 = vpop.permute.xlu0 %508 }
  0x96   : > { %4753 = vmatmul.mubr.msk.f32.vlgmr.msra.gmra.mrb[0].mxu0 %vm190_vm2, %v4750_v16  ;;  %4757 = vmatprep.subr.msk.mxu0 %vm194_vm1, %v5274_v3  ;;  %v189_v19 = vsel %vm186_vm0, %v183_v10, %v185_v17  ;;  %v516_v20 = vsel %vm514_vm3, %v509_v18, %v511_v12  ;;  %vm2844_vm0 = vcmask 457728  }
  0x97   : > { %4754 = vmatprep.subr.msk.mxu1 %vm194_vm1, %v185_v17  ;;  %4758 = vmatpush1.msk.msra.mxu0 %vm194_vm1, %v5268_v2 }
  0x98   : > { %2840 = vrot.lane.b32.xlu1 %v5278_v4, %s5175_s25  ;;  %4755 = vmatpush1.msk.msra.mxu1 %vm194_vm1, %v189_v19 }
  0x99   : > { %2838 = vrot.lane.b32.xlu0 %v5265_v1, %s5175_s25  ;;  %4764 = vmatprep.subr.msk.mxu0 %vm194_vm1, %v516_v20  ;;  %v513_v21 = vpop.permute.xlu1 %512  ;;  %v507_v22 = vpop.permute.xlu0 %506 }
  0x9a   : > { %4756 = vmatmul.mubr.msk.f32.vlgmr.msra.gmra.mrb[0].mxu1 %vm190_vm2, %v4750_v16  ;;  %4760 = vmatprep.subr.msk.mxu1 %vm194_vm1, %v5278_v4  ;;  %v515_v27 = vsel %vm514_vm3, %v507_v22, %v509_v18  ;;  %v517_v32 = vsel %vm514_vm3, %v511_v12, %v513_v21  ;;  %v3738_v16 = vld [vmem:[%s5262_s28 + $0x10] sm:$0xf]  ;;  %v4798_v18 = vld [vmem:[%s5789_s0 + $0x1c] sm:$0xf]  ;;  %vm3026_vm3 = vcmask 449536  }
  0x9b   : > { %420 = vmatprep.mubr.f32.mxu0 %v5160_v0  ;;  %4761 = vmatpush1.msk.msra.mxu1 %vm194_vm1, %v5265_v1 }
  0x9c   : > { %2834 = vrot.lane.b32.xlu1 %v5268_v2, %s5175_s25  ;;  %4767 = vmatprep.subr.msk.mxu1 %vm194_vm1, %v513_v21 }
  0x9d   : > { %2842 = vrot.lane.b32.xlu0 %v2828_v23, %s5175_s25  ;;  %v688_v25 = vpop.permute.xlu1 %687  ;;  %v686_v26 = vpop.permute.xlu0 %685  ;;  %491 = vmatprep.mubr.f32.mxu1 %v5160_v0  ;;  %s4671_s25 = scalar_lea.sflag [#allocation3], %s161_s8 }
  0x9e   : > { %4759 = vmatmul.mubr.msk.f32.vlgmr.msra.gmra.mrb[0].mxu0 %vm190_vm2, %v169_v24  ;;  %v693_v28 = vsel %vm691_vm4, %v686_v26, %v688_v25 }
  0x9f   : > { %4765 = vmatpush1.msk.msra.mxu0 %vm194_vm1, %v515_v27  ;;  %593 = vmatprep.mubr.f32.mxu0 %v5160_v0 }
  0xa0   : > { %3020 = vrot.lane.b32.xlu1 %v5265_v1, %s5176_s4  ;;  %4771 = vmatprep.subr.msk.mxu0 %vm194_vm1, %v693_v28 }
  0xa1   : > { %3018 = vrot.lane.b32.xlu0 %v5274_v3, %s5176_s4  ;;  %v690_v29 = vpop.permute.xlu1 %689  ;;  %v684_v30 = vpop.permute.xlu0 %683 }
  0xa2   : > { %4762 = vmatmul.mubr.msk.f32.vlgmr.msra.gmra.mrb[0].mxu1 %vm190_vm2, %v169_v24  ;;  %v692_v36 = vsel %vm691_vm4, %v684_v30, %v686_v26  ;;  %v694_v40 = vsel %vm691_vm4, %v688_v25, %v690_v29  ;;  %v4805_v26 = vld [vmem:[%s5789_s0 + $0x20] sm:$0xf]  ;;  %vm3208_vm4 = vcmask 441344  }
  0xa3   : > { %4768 = vmatpush1.msk.msra.mxu1 %vm194_vm1, %v517_v32  ;;  %664 = vmatprep.mubr.f32.mxu1 %v5160_v0 }
  0xa4   : > { %3024 = vrot.lane.b32.xlu1 %v3010_v31, %s5176_s4  ;;  %4774 = vmatprep.subr.msk.mxu1 %vm194_vm1, %v690_v29  ;;  %v3920_v31 = vld [vmem:[%s5262_s28 + $0x10] sm:$0xf] }
  0xa5   : > { %3022 = vrot.lane.b32.xlu0 %v5278_v4, %s5176_s4  ;;  %v865_v34 = vpop.permute.xlu1 %864  ;;  %v863_v35 = vpop.permute.xlu0 %862 }
  0xa6   : > { %4766 = vmatmul.mubr.msk.f32.vlgmr.msra.gmra.mrb[0].mxu0 %vm190_vm2, %v4763_v33  ;;  %v870_v37 = vsel %vm868_vm5, %v863_v35, %v865_v34 }
  0xa7   : > { %4772 = vmatpush1.msk.msra.mxu0 %vm194_vm1, %v692_v36  ;;  %770 = vmatprep.mubr.f32.mxu0 %v5160_v0  ;;  %v4812_v36 = vld [vmem:[%s5789_s0 + $0x24] sm:$0xf] }
  0xa8   : > { %3200 = vrot.lane.b32.xlu1 %v5274_v3, %s5177_s7  ;;  %4778 = vmatprep.subr.msk.mxu0 %vm194_vm1, %v870_v37 }
  0xa9   : > { %3016 = vrot.lane.b32.xlu0 %v5268_v2, %s5176_s4  ;;  %v867_v38 = vpop.permute.xlu1 %866  ;;  %v861_v39 = vpop.permute.xlu0 %860  ;;  %s5181_s4 = smov 31  }
  0xaa   : > { %4769 = vmatmul.mubr.msk.f32.vlgmr.msra.gmra.mrb[0].mxu1 %vm190_vm2, %v4763_v33  ;;  %v869_v44 = vsel %vm868_vm5, %v861_v39, %v863_v35  ;;  %v871_v49 = vsel %vm868_vm5, %v865_v34, %v867_v38  ;;  %v4102_v39 = vld [vmem:[%s5262_s28 + $0x10] sm:$0xf]  ;;  %vm3390_vm5 = vcmask 433152  }
  0xab   : > { %4775 = vmatpush1.msk.msra.mxu1 %vm194_vm1, %v694_v40  ;;  %841 = vmatprep.mubr.f32.mxu1 %v5160_v0 }
  0xac   : > { %3204 = vrot.lane.b32.xlu1 %v5278_v4, %s5177_s7  ;;  %4781 = vmatprep.subr.msk.mxu1 %vm194_vm1, %v867_v38 }
  0xad   : > { %3202 = vrot.lane.b32.xlu0 %v5265_v1, %s5177_s7  ;;  %v1042_v42 = vpop.permute.xlu1 %1041  ;;  %v1040_v43 = vpop.permute.xlu0 %1039 }
  0xae   : > { %4773 = vmatmul.mubr.msk.f32.vlgmr.msra.gmra.mrb[0].mxu0 %vm190_vm2, %v4770_v41  ;;  %v1047_v45 = vsel %vm1045_vm6, %v1040_v43, %v1042_v42 }
  0xaf   : > { %4779 = vmatpush1.msk.msra.mxu0 %vm194_vm1, %v869_v44  ;;  %947 = vmatprep.mubr.f32.mxu0 %v5160_v0 }
  0xb0   : > { %3198 = vrot.lane.b32.xlu1 %v5268_v2, %s5177_s7  ;;  %4785 = vmatprep.subr.msk.mxu0 %vm194_vm1, %v1047_v45  ;;  %v4819_v45 = vld [vmem:[%s5789_s0 + $0x28] sm:$0xf] }
  0xb1   : > { %3206 = vrot.lane.b32.xlu0 %v3192_v46, %s5177_s7  ;;  %v1044_v47 = vpop.permute.xlu1 %1043  ;;  %v1038_v48 = vpop.permute.xlu0 %1037 }
  0xb2   : > { %4776 = vmatmul.mubr.msk.f32.vlgmr.msra.gmra.mrb[0].mxu1 %vm190_vm2, %v4770_v41  ;;  %v1046_v54 = vsel %vm1045_vm6, %v1038_v48, %v1040_v43  ;;  %v1048_v58 = vsel %vm1045_vm6, %v1042_v42, %v1044_v47  ;;  %vm3572_vm6 = vcmask 424960  }
  0xb3   : > { %4782 = vmatpush1.msk.msra.mxu1 %vm194_vm1, %v871_v49  ;;  %1018 = vmatprep.mubr.f32.mxu1 %v5160_v0 }
  0xb4   : > { %3384 = vrot.lane.b32.xlu1 %v5265_v1, %s5178_s17  ;;  %4788 = vmatprep.subr.msk.mxu1 %vm194_vm1, %v1044_v47 }
  0xb5   : > { %3382 = vrot.lane.b32.xlu0 %v5274_v3, %s5178_s17  ;;  %v1219_v51 = vpop.permute.xlu1 %1218  ;;  %v1217_v52 = vpop.permute.xlu0 %1216 }
  0xb6   : > { %4780 = vmatmul.mubr.msk.f32.vlgmr.msra.gmra.mrb[0].mxu0 %vm190_vm2, %v4777_v50  ;;  %v1224_v55 = vsel %vm1222_vm7, %v1217_v52, %v1219_v51 }
  0xb7   : > { %4786 = vmatpush1.msk.msra.mxu0 %vm194_vm1, %v1046_v54  ;;  %1124 = vmatprep.mubr.f32.mxu0 %v5160_v0  ;;  %v4284_v54 = vld [vmem:[%s5262_s28 + $0x10] sm:$0xf] }
  0xb8   : > { %3388 = vrot.lane.b32.xlu1 %v3374_v53, %s5178_s17  ;;  %4792 = vmatprep.subr.msk.mxu0 %vm194_vm1, %v1224_v55 }
  0xb9   : > { %3386 = vrot.lane.b32.xlu0 %v5278_v4, %s5178_s17  ;;  %v1221_v56 = vpop.permute.xlu1 %1220  ;;  %v1215_v57 = vpop.permute.xlu0 %1214 }
  0xba   : > { %4783 = vmatmul.mubr.msk.f32.vlgmr.msra.gmra.mrb[0].mxu1 %vm190_vm2, %v4777_v50  ;;  %v1223_v62 = vsel %vm1222_vm7, %v1215_v57, %v1217_v52  ;;  %v1225_v7 = vsel %vm1222_vm7, %v1219_v51, %v1221_v56  ;;  %v4826_v57 = vld [vmem:[%s5789_s0 + $0x2c] sm:$0xf]  ;;  %vm3754_vm7 = vcmask 261120  }
  0xbb   : > { %4789 = vmatpush1.msk.msra.mxu1 %vm194_vm1, %v1048_v58  ;;  %1195 = vmatprep.mubr.f32.mxu1 %v5160_v0 }
  0xbc   : > { %3564 = vrot.lane.b32.xlu1 %v5274_v3, %s5179_s24  ;;  %4795 = vmatprep.subr.msk.mxu1 %vm194_vm1, %v1221_v56 }
  0xbd   : > { %3380 = vrot.lane.b32.xlu0 %v5268_v2, %s5178_s17  ;;  %v1396_v60 = vpop.permute.xlu1 %1395  ;;  %v1394_v61 = vpop.permute.xlu0 %1393  ;;  %s5183_s17 = smov 29  }
  0xbe   : > { %4787 = vmatmul.mubr.msk.f32.vlgmr.msra.gmra.mrb[0].mxu0 %vm190_vm2, %v4784_v59  ;;  %v1401_v63 = vsel %vm1399_vm8, %v1394_v61, %v1396_v60 }
  0xbf   : > { %4793 = vmatpush1.msk.msra.mxu0 %vm194_vm1, %v1223_v62  ;;  %1301 = vmatprep.mubr.f32.mxu0 %v5160_v0 }
  0xc0   : > { %3568 = vrot.lane.b32.xlu1 %v5278_v4, %s5179_s24  ;;  %4799 = vmatprep.subr.msk.mxu0 %vm194_vm1, %v1401_v63  ;;  %v4466_v63 = vld [vmem:[%s5262_s28 + $0x10] sm:$0xf]  ;;  %s5100_s28 = sshll.u32 %s5186_s16, 4  ;;  %s5101_s28 = int_to_ptr.vmem [resolvable:$false] %s5100_s28 }
  0xc1   : > { %3566 = vrot.lane.b32.xlu0 %v5265_v1, %s5179_s24  ;;  %v1398_v5 = vpop.permute.xlu1 %1397  ;;  %v1392_v6 = vpop.permute.xlu0 %1391 }
  0xc2   : > { %4790 = vmatmul.mubr.msk.f32.vlgmr.msra.gmra.mrb[0].mxu1 %vm190_vm2, %v4784_v59  ;;  %v1400_v12 = vsel %vm1399_vm8, %v1392_v6, %v1394_v61  ;;  %v1402_v17 = vsel %vm1399_vm8, %v1396_v60, %v1398_v5  ;;  %v5185_v60 = vmov 0   ;;  %vm3936_vm8 = vcmask 252928  }
  0xc3   : > { %4796 = vmatpush1.msk.msra.mxu1 %vm194_vm1, %v1225_v7  ;;  %1372 = vmatprep.mubr.f32.mxu1 %v5160_v0  ;;  %v4644_v7 = vld [vmem:[%s5790_s1] sm:$0xf] }
  0xc4   : > { %3562 = vrot.lane.b32.xlu1 %v5268_v2, %s5179_s24  ;;  %4802 = vmatprep.subr.msk.mxu1 %vm194_vm1, %v1398_v5 }
  0xc5   : > { %3570 = vrot.lane.b32.xlu0 %v3556_v8, %s5179_s24  ;;  %v1573_v10 = vpop.permute.xlu1 %1572  ;;  %v1571_v11 = vpop.permute.xlu0 %1570  ;;  %s5184_s24 = smov 28   ;;  %5092 = vset.pattern.permute.xlu1 %v5185_v60 }
  0xc6   : > { %4794 = vmatmul.mubr.msk.f32.vlgmr.msra.gmra.mrb[0].mxu0 %vm190_vm2, %v4791_v9  ;;  %v1578_v13 = vsel %vm1576_vm9, %v1571_v11, %v1573_v10  ;;  %5093 = vset.pattern.permute.xlu0 %v5185_v60  ;;  %v4875_v60 = vld [vmem:[%s5789_s0 + $0x48] sm:$0xf] }
  0xc7   : > { %4800 = vmatpush1.msk.msra.mxu0 %vm194_vm1, %v1400_v12  ;;  %1478 = vmatprep.mubr.f32.mxu0 %v5160_v0 }
  0xc8   : > { %3748 = vrot.lane.b32.xlu1 %v5265_v1, %s5180_s27  ;;  %4806 = vmatprep.subr.msk.mxu0 %vm194_vm1, %v1578_v13 }
  0xc9   : > { %3746 = vrot.lane.b32.xlu0 %v5274_v3, %s5180_s27  ;;  %v1575_v14 = vpop.permute.xlu1 %1574  ;;  %v1569_v15 = vpop.permute.xlu0 %1568 }
  0xca   : > { %4797 = vmatmul.mubr.msk.f32.vlgmr.msra.gmra.mrb[0].mxu1 %vm190_vm2, %v4791_v9  ;;  %v1577_v21 = vsel %vm1576_vm9, %v1569_v15, %v1571_v11  ;;  %v1579_v25 = vsel %vm1576_vm9, %v1573_v10, %v1575_v14  ;;  %vm4118_vm9 = vcmask 244736  }
  0xcb   : > { %4803 = vmatpush1.msk.msra.mxu1 %vm194_vm1, %v1402_v17  ;;  %1549 = vmatprep.mubr.f32.mxu1 %v5160_v0 }
  0xcc   : > { %3752 = vrot.lane.b32.xlu1 %v3738_v16, %s5180_s27  ;;  %4809 = vmatprep.subr.msk.mxu1 %vm194_vm1, %v1575_v14  ;;  %v4840_v14 = vld [vmem:[%s5789_s0 + $0x34] sm:$0xf] }
  0xcd   : > { %3750 = vrot.lane.b32.xlu0 %v5278_v4, %s5180_s27  ;;  %v1750_v19 = vpop.permute.xlu1 %1749  ;;  %v1748_v20 = vpop.permute.xlu0 %1747 }
  0xce   : > { %4801 = vmatmul.mubr.msk.f32.vlgmr.msra.gmra.mrb[0].mxu0 %vm190_vm2, %v4798_v18  ;;  %v1755_v22 = vsel %vm1753_vm10, %v1748_v20, %v1750_v19 }
  0xcf   : > { %4807 = vmatpush1.msk.msra.mxu0 %vm194_vm1, %v1577_v21  ;;  %1655 = vmatprep.mubr.f32.mxu0 %v5160_v0 }
  0xd0   : > { %3928 = vrot.lane.b32.xlu1 %v5274_v3, %s5181_s4  ;;  %4813 = vmatprep.subr.msk.mxu0 %vm194_vm1, %v1755_v22  ;;  %v4847_v22 = vld [vmem:[%s5789_s0 + $0x38] sm:$0xf] }
  0xd1   : > { %3744 = vrot.lane.b32.xlu0 %v5268_v2, %s5180_s27  ;;  %v1752_v23 = vpop.permute.xlu1 %1751  ;;  %v1746_v24 = vpop.permute.xlu0 %1745  ;;  %s5102_s27 = scalar_lea.vmem %s5101_s28, 512 }
  0xd2   : > { %4804 = vmatmul.mubr.msk.f32.vlgmr.msra.gmra.mrb[0].mxu1 %vm190_vm2, %v4798_v18  ;;  %v1754_v29 = vsel %vm1753_vm10, %v1746_v24, %v1748_v20  ;;  %v1756_v34 = vsel %vm1753_vm10, %v1750_v19, %v1752_v23  ;;  %vm4300_vm10 = vcmask 236544  }
  0xd3   : > { %4810 = vmatpush1.msk.msra.mxu1 %vm194_vm1, %v1579_v25  ;;  %1726 = vmatprep.mubr.f32.mxu1 %v5160_v0 }
  0xd4   : > { %3932 = vrot.lane.b32.xlu1 %v5278_v4, %s5181_s4  ;;  %4816 = vmatprep.subr.msk.mxu1 %vm194_vm1, %v1752_v23 }
  0xd5   : > { %3930 = vrot.lane.b32.xlu0 %v5265_v1, %s5181_s4  ;;  %v1929_v27 = vpop.permute.xlu1 %1928  ;;  %v1927_v28 = vpop.permute.xlu0 %1926 }
  0xd6   : > { %4808 = vmatmul.mubr.msk.f32.vlgmr.msra.gmra.mrb[0].mxu0 %vm190_vm2, %v4805_v26  ;;  %v1936_v30 = vsel %vm1934_vm11, %v1927_v28, %v1929_v27 }
  0xd7   : > { %4814 = vmatpush1.msk.msra.mxu0 %vm194_vm1, %v1754_v29  ;;  %1832 = vmatprep.mubr.f32.mxu0 %v5160_v0 }
  0xd8   : > { %3926 = vrot.lane.b32.xlu1 %v5268_v2, %s5181_s4  ;;  %4820 = vmatprep.subr.msk.mxu0 %vm194_vm1, %v1936_v30 }
  0xd9   : > { %3934 = vrot.lane.b32.xlu0 %v3920_v31, %s5181_s4  ;;  %v1933_v32 = vpop.permute.xlu1 %1932  ;;  %v1931_v33 = vpop.permute.xlu0 %1930  ;;  %v4854_v31 = vld [vmem:[%s5789_s0 + $0x3c] sm:$0xf] }
  0xda   : > { %4811 = vmatmul.mubr.msk.f32.vlgmr.msra.gmra.mrb[0].mxu1 %vm190_vm2, %v4805_v26  ;;  %v1938_v35 = vsel %vm1934_vm11, %v1931_v33, %v1933_v32  ;;  %v1937_v43 = vsel %vm1934_vm11, %v1929_v27, %v1931_v33 }
  0xdb   : > { %4817 = vmatpush1.msk.msra.mxu1 %vm194_vm1, %v1756_v34  ;;  %1903 = vmatprep.mubr.f32.mxu1 %v5160_v0 }
  0xdc   : > { %4112 = vrot.lane.b32.xlu1 %v5265_v1, %s5182_s9  ;;  %4823 = vmatprep.subr.msk.mxu1 %vm194_vm1, %v1938_v35 }
  0xdd   : > { %4110 = vrot.lane.b32.xlu0 %v5274_v3, %s5182_s9  ;;  %v2109_v37 = vpop.permute.xlu1 %2108  ;;  %v1925_v38 = vpop.permute.xlu0 %1924 }
  0xde   : > { %v1935_v40 = vsel %vm1934_vm11, %v1925_v38, %v1927_v28  ;;  %4815 = vmatmul.mubr.msk.f32.vlgmr.msra.gmra.mrb[0].mxu0 %vm190_vm2, %v4812_v36  ;;  %vm4482_vm11 = vcmask 228352  }
  0xdf   : > { %4821 = vmatpush1.msk.msra.mxu0 %vm194_vm1, %v1935_v40  ;;  %2014 = vmatprep.mubr.f32.mxu0 %v5160_v0  ;;  %v4861_v40 = vld [vmem:[%s5789_s0 + $0x40] sm:$0xf] }
  0xe0   : > { %4116 = vrot.lane.b32.xlu1 %v4102_v39, %s5182_s9 }
  0xe1   : > { %4114 = vrot.lane.b32.xlu0 %v5278_v4, %s5182_s9  ;;  %v2113_v41 = vpop.permute.xlu1 %2112  ;;  %v2111_v42 = vpop.permute.xlu0 %2110 }
  0xe2   : > { %4818 = vmatmul.mubr.msk.f32.vlgmr.msra.gmra.mrb[0].mxu1 %vm190_vm2, %v4812_v36  ;;  %v2118_v44 = vsel %vm2116_vm12, %v2109_v37, %v2111_v42  ;;  %v2119_v52 = vsel %vm2116_vm12, %v2111_v42, %v2113_v41 }
  0xe3   : > { %4824 = vmatpush1.msk.msra.mxu1 %vm194_vm1, %v1937_v43  ;;  %4827 = vmatprep.subr.msk.mxu0 %vm194_vm1, %v2118_v44 }
  0xe4   : > { %4292 = vrot.lane.b32.xlu1 %v5274_v3, %s5183_s17  ;;  %2085 = vmatprep.mubr.f32.mxu1 %v5160_v0 }
  0xe5   : > { %4108 = vrot.lane.b32.xlu0 %v5268_v2, %s5182_s9  ;;  %v2107_v46 = vpop.permute.xlu1 %2106  ;;  %v2115_v47 = vpop.permute.xlu0 %2114  ;;  %s4748_s9 = sshll.u32 %s161_s8, 4 }
  0xe6   : > { %v2117_v48 = vsel %vm2116_vm12, %v2107_v46, %v2109_v37  ;;  %v2120_v49 = vsel %vm2116_vm12, %v2113_v41, %v2115_v47  ;;  %4822 = vmatmul.mubr.msk.f32.vlgmr.msra.gmra.mrb[0].mxu0 %vm190_vm2, %v4819_v45  ;;  %vm4667_vm12 = vcmask 785412   ;;  %s163_s11 = scalar_lea.vmem [#allocation2], %s4748_s9 }
  0xe7   : > { %4828 = vmatpush1.msk.msra.mxu0 %vm194_vm1, %v2117_v48  ;;  %4830 = vmatprep.subr.msk.mxu1 %vm194_vm1, %v2120_v49 }
  0xe8   : > { %4296 = vrot.lane.b32.xlu1 %v5278_v4, %s5183_s17  ;;  %2196 = vmatprep.mubr.f32.mxu0 %v5160_v0 }
  0xe9   : > { %4294 = vrot.lane.b32.xlu0 %v5265_v1, %s5183_s17  ;;  %v2293_v50 = vpop.permute.xlu1 %2292  ;;  %v2291_v51 = vpop.permute.xlu0 %2290 }
  0xea   : > { %4825 = vmatmul.mubr.msk.f32.vlgmr.msra.gmra.mrb[0].mxu1 %vm190_vm2, %v4819_v45  ;;  %v2300_v53 = vsel %vm2298_vm13, %v2291_v51, %v2293_v50 }
  0xeb   : > { %4831 = vmatpush1.msk.msra.mxu1 %vm194_vm1, %v2119_v52  ;;  %4834 = vmatprep.subr.msk.mxu0 %vm194_vm1, %v2300_v53 }
  0xec   : > { %4290 = vrot.lane.b32.xlu1 %v5268_v2, %s5183_s17  ;;  %2267 = vmatprep.mubr.f32.mxu1 %v5160_v0 }
  0xed   : > { %4298 = vrot.lane.b32.xlu0 %v4284_v54, %s5183_s17  ;;  %v2297_v55 = vpop.permute.xlu1 %2296  ;;  %v2295_v56 = vpop.permute.xlu0 %2294  ;;  %s4685_s17 = sshll.u32 %s163_s11, 4  ;;  %s5749_s17 = int_to_ptr.vmem [resolvable:$true] %s4685_s17 }
  0xee   : > { %v2302_v58 = vsel %vm2298_vm13, %v2295_v56, %v2297_v55  ;;  %4829 = vmatmul.mubr.msk.f32.vlgmr.msra.gmra.mrb[0].mxu0 %vm190_vm2, %v4826_v57  ;;  %v2301_v59 = vsel %vm2298_vm13, %v2293_v50, %v2295_v56  ;;  %s5096_s26 = scalar_lea.vmem %s5749_s17, 256  ;;  %p5103_p0 = scmp.lt.s32.totalorder %s5749_s17, %s5101_s28 }
  0xef   : > { %4837 = vmatprep.subr.msk.mxu1 %vm194_vm1, %v2302_v58  ;;  %2378 = vmatprep.mubr.f32.mxu0 %v5160_v0  ;;  %p5097_p11 = scmp.ne.s32.totalorder %s5749_s17, %s5096_s26  ;;  %p5104_p1 = scmp.lt.s32.totalorder %s5102_s27, %s5096_s26 }
  0xf0   : > { %4476 = vrot.lane.b32.xlu1 %v5265_v1, %s5184_s24  ;;  %v4833_v1 = vld [vmem:[%s5789_s0 + $0x30] sm:$0xf] }
  0xf1   : > { %4474 = vrot.lane.b32.xlu0 %v5274_v3, %s5184_s24  ;;  %v2473_v61 = vpop.permute.xlu1 %2472  ;;  %v2289_v62 = vpop.permute.xlu0 %2288  ;;  %p5098_p12 = pnand %p5097_p11, %p5245_p5  ;;  %p5105_p2 = por %p5104_p1, %p5103_p0 }
  0xf2   : > { %4832 = vmatmul.mubr.msk.f32.vlgmr.msra.gmra.mrb[0].mxu1 %vm190_vm2, %v4826_v57  ;;  %v2299_v5 = vsel %vm2298_vm13, %v2289_v62, %v2291_v51  ;;  %v4868_v51 = vld [vmem:[%s5789_s0 + $0x44] sm:$0xf]  ;;  %vm4668_vm13 = vmor %vm4667_vm12, %vm194_vm1 }
  0xf3   : > { %4838 = vmatpush1.msk.msra.mxu1 %vm194_vm1, %v2301_v59  ;;  %4835 = vmatpush1.msk.msra.mxu0 %vm194_vm1, %v2299_v5  ;;  %p5099_p13 = pneg %p5098_p12 }
  0xf4   : > { %4480 = vrot.lane.b32.xlu1 %v4466_v63, %s5184_s24  ;;  %2449 = vmatprep.mubr.f32.mxu1 %v5160_v0 }
  0xf5   : > { %4478 = vrot.lane.b32.xlu0 %v5278_v4, %s5184_s24  ;;  %v2477_v3 = vpop.permute.xlu1 %2476  ;;  %v2475_v6 = vpop.permute.xlu0 %2474  ;;  %p5106_p3 = pnand %p5105_p2, %p5099_p13 }
  0xf6   : > { %v2482_v8 = vsel %vm2480_vm14, %v2473_v61, %v2475_v6  ;;  %4836 = vmatmul.mubr.msk.f32.vlgmr.msra.gmra.mrb[0].mxu0 %vm190_vm2, %v4833_v1  ;;  %v2483_v12 = vsel %vm2480_vm14, %v2475_v6, %v2477_v3 }
  0xf7   : > { %4841 = vmatprep.subr.msk.mxu0 %vm194_vm1, %v2482_v8  ;;  %2560 = vmatprep.mubr.f32.mxu0 %v5160_v0 }
  0xf8   : > { %4647 = vperm.xlu1 %5092, %v4644_v7  }
  0xf9   : > { %4472 = vrot.lane.b32.xlu0 %v5268_v2, %s5184_s24  ;;  %v2471_v9 = vpop.permute.xlu1 %2470  ;;  %v2479_v10 = vpop.permute.xlu0 %2478  ;;  %s5747_s24 = scalar_lea.hbm %s5792_s3, %s4929_s10 }
  0xfa   : > { %v2481_v4 = vsel %vm2480_vm14, %v2471_v9, %v2473_v61  ;;  %v2484_v11 = vsel %vm2480_vm14, %v2477_v3, %v2479_v10  ;;  %4839 = vmatmul.mubr.msk.f32.vlgmr.msra.gmra.mrb[0].mxu1 %vm190_vm2, %v4833_v1  ;;  %v4882_v10 = vld [vmem:[%s5789_s0 + $0x4c] sm:$0xf] }
  0xfb   : > { %4842 = vmatpush1.msk.msra.mxu0 %vm194_vm1, %v2481_v4  ;;  %4844 = vmatprep.subr.msk.mxu1 %vm194_vm1, %v2484_v11 }
  0xfc   : > { %4845 = vmatpush1.msk.msra.mxu1 %vm194_vm1, %v2483_v12  ;;  %2631 = vmatprep.mubr.f32.mxu1 %v5160_v0 }
  0xfd   : > { %v2657_v2 = vpop.permute.xlu1 %2656  ;;  %v2655_v13 = vpop.permute.xlu0 %2654 }
  0xfe   : > { %v2664_v15 = vsel %vm2662_vm15, %v2655_v13, %v2657_v2  ;;  %4843 = vmatmul.mubr.msk.f32.vlgmr.msra.gmra.mrb[0].mxu0 %vm190_vm2, %v4840_v14 }
  0xff   : > { %4848 = vmatprep.subr.msk.mxu0 %vm194_vm1, %v2664_v15  ;;  %2742 = vmatprep.mubr.f32.mxu0 %v5160_v0 }
 0x101   : > { %v2661_v16 = vpop.permute.xlu1 %2660  ;;  %v2659_v17 = vpop.permute.xlu0 %2658 }
 0x102   : > { %v2665_v18 = vsel %vm2662_vm15, %v2657_v2, %v2659_v17  ;;  %v2666_v19 = vsel %vm2662_vm15, %v2659_v17, %v2661_v16  ;;  %4846 = vmatmul.mubr.msk.f32.vlgmr.msra.gmra.mrb[0].mxu1 %vm190_vm2, %v4840_v14  ;;  %v4889_v17 = vld [vmem:[%s5789_s0 + $0x50] sm:$0xf] }
 0x103   : > { %4851 = vmatprep.subr.msk.mxu1 %vm194_vm1, %v2666_v19  ;;  %2813 = vmatprep.mubr.f32.mxu1 %v5160_v0 }
 0x104   : > { %4852 = vmatpush1.msk.msra.mxu1 %vm194_vm1, %v2665_v18 }
 0x105   : > { %v2837_v20 = vpop.permute.xlu1 %2836  ;;  %v2653_v21 = vpop.permute.xlu0 %2652 }
 0x106   : > { %v2663_v23 = vsel %vm2662_vm15, %v2653_v21, %v2655_v13 }
 0x107   : > { %4849 = vmatpush1.msk.msra.mxu0 %vm194_vm1, %v2663_v23 }
 0x108   : > { %4850 = vmatmul.mubr.msk.f32.vlgmr.msra.gmra.mrb[0].mxu0 %vm190_vm2, %v4847_v22 }
 0x109   : > { %2924 = vmatprep.mubr.f32.mxu0 %v5160_v0 }
 0x10a   : > { %v2841_v24 = vpop.permute.xlu1 %2840  ;;  %4853 = vmatmul.mubr.msk.f32.vlgmr.msra.gmra.mrb[0].mxu1 %vm190_vm2, %v4847_v22 }
 0x10b   : > { %v2839_v25 = vpop.permute.xlu0 %2838  ;;  %2995 = vmatprep.mubr.f32.mxu1 %v5160_v0 }
 0x10c   : > { %v2846_v26 = vsel %vm2844_vm0, %v2837_v20, %v2839_v25  ;;  %v2847_v32 = vsel %vm2844_vm0, %v2839_v25, %v2841_v24 }
 0x10d   : > { %4855 = vmatprep.subr.msk.mxu0 %vm194_vm1, %v2846_v26 }
 0x10e   : > { %v2835_v27 = vpop.permute.xlu1 %2834 }
 0x10f   : > { %v2845_v28 = vsel %vm2844_vm0, %v2835_v27, %v2837_v20  ;;  %v2843_v29 = vpop.permute.xlu0 %2842 }
 0x110   : > { %v2848_v30 = vsel %vm2844_vm0, %v2841_v24, %v2843_v29  ;;  %4856 = vmatpush1.msk.msra.mxu0 %vm194_vm1, %v2845_v28  ;;  %v4896_v28 = vld [vmem:[%s5789_s0 + $0x54] sm:$0xf] }
 0x111   : > { %4858 = vmatprep.subr.msk.mxu1 %vm194_vm1, %v2848_v30  ;;  %4857 = vmatmul.mubr.msk.f32.vlgmr.msra.gmra.mrb[0].mxu0 %vm190_vm2, %v4854_v31 }
 0x112   : > { %4859 = vmatpush1.msk.msra.mxu1 %vm194_vm1, %v2847_v32  ;;  %v3021_v33 = vpop.permute.xlu1 %3020  ;;  %3106 = vmatprep.mubr.f32.mxu0 %v5160_v0 }
 0x113   : > { %v3019_v34 = vpop.permute.xlu0 %3018  ;;  %4860 = vmatmul.mubr.msk.f32.vlgmr.msra.gmra.mrb[0].mxu1 %vm190_vm2, %v4854_v31 }
 0x114   : > { %v3028_v35 = vsel %vm3026_vm3, %v3019_v34, %v3021_v33  ;;  %3177 = vmatprep.mubr.f32.mxu1 %v5160_v0 }
 0x115   : > { %4862 = vmatprep.subr.msk.mxu0 %vm194_vm1, %v3028_v35 }
 0x116   : > { %v3025_v36 = vpop.permute.xlu1 %3024 }
 0x117   : > { %v3023_v37 = vpop.permute.xlu0 %3022 }
 0x118   : > { %v3029_v38 = vsel %vm3026_vm3, %v3021_v33, %v3023_v37  ;;  %v3030_v39 = vsel %vm3026_vm3, %v3023_v37, %v3025_v36  ;;  %v4903_v37 = vld [vmem:[%s5789_s0 + $0x58] sm:$0xf] }
 0x119   : > { %4865 = vmatprep.subr.msk.mxu1 %vm194_vm1, %v3030_v39 }
 0x11a   : > { %4866 = vmatpush1.msk.msra.mxu1 %vm194_vm1, %v3029_v38  ;;  %v3201_v41 = vpop.permute.xlu1 %3200 }
 0x11b   : > { %v3017_v42 = vpop.permute.xlu0 %3016  ;;  %4867 = vmatmul.mubr.msk.f32.vlgmr.msra.gmra.mrb[0].mxu1 %vm190_vm2, %v4861_v40 }
 0x11c   : > { %v3027_v43 = vsel %vm3026_vm3, %v3017_v42, %v3019_v34  ;;  %3359 = vmatprep.mubr.f32.mxu1 %v5160_v0 }
 0x11d   : > { %4863 = vmatpush1.msk.msra.mxu0 %vm194_vm1, %v3027_v43 }
 0x11e   : > { %v3205_v44 = vpop.permute.xlu1 %3204  ;;  %4864 = vmatmul.mubr.msk.f32.vlgmr.msra.gmra.mrb[0].mxu0 %vm190_vm2, %v4861_v40 }
 0x11f   : > { %v3203_v45 = vpop.permute.xlu0 %3202  ;;  %3288 = vmatprep.mubr.f32.mxu0 %v5160_v0 }
 0x120   : > { %v3210_v46 = vsel %vm3208_vm4, %v3201_v41, %v3203_v45  ;;  %v3211_v52 = vsel %vm3208_vm4, %v3203_v45, %v3205_v44 }
 0x121   : > { %4869 = vmatprep.subr.msk.mxu0 %vm194_vm1, %v3210_v46 }
 0x122   : > { %v3199_v47 = vpop.permute.xlu1 %3198 }
 0x123   : > { %v3209_v48 = vsel %vm3208_vm4, %v3199_v47, %v3201_v41  ;;  %v3207_v49 = vpop.permute.xlu0 %3206 }
 0x124   : > { %v3212_v50 = vsel %vm3208_vm4, %v3205_v44, %v3207_v49  ;;  %4870 = vmatpush1.msk.msra.mxu0 %vm194_vm1, %v3209_v48  ;;  %v4910_v48 = vld [vmem:[%s5789_s0 + $0x5c] sm:$0xf] }
 0x125   : > { %4872 = vmatprep.subr.msk.mxu1 %vm194_vm1, %v3212_v50 }
 0x126   : > { %4873 = vmatpush1.msk.msra.mxu1 %vm194_vm1, %v3211_v52  ;;  %v3385_v53 = vpop.permute.xlu1 %3384  ;;  %4871 = vmatmul.mubr.msk.f32.vlgmr.msra.gmra.mrb[0].mxu0 %vm190_vm2, %v4868_v51 }
 0x127   : > { %v3383_v54 = vpop.permute.xlu0 %3382  ;;  %4874 = vmatmul.mubr.msk.f32.vlgmr.msra.gmra.mrb[0].mxu1 %vm190_vm2, %v4868_v51  ;;  %3470 = vmatprep.mubr.f32.mxu0 %v5160_v0 }
 0x128   : > { %v3392_v55 = vsel %vm3390_vm5, %v3383_v54, %v3385_v53  ;;  %3541 = vmatprep.mubr.f32.mxu1 %v5160_v0 }
 0x129   : > { %4876 = vmatprep.subr.msk.mxu0 %vm194_vm1, %v3392_v55 }
 0x12a   : > { %v3389_v56 = vpop.permute.xlu1 %3388 }
 0x12b   : > { %v3387_v57 = vpop.permute.xlu0 %3386 }
 0x12c   : > { %v3393_v58 = vsel %vm3390_vm5, %v3385_v53, %v3387_v57  ;;  %v3394_v59 = vsel %vm3390_vm5, %v3387_v57, %v3389_v56  ;;  %v4917_v57 = vld [vmem:[%s5789_s0 + $0x60] sm:$0xf] }
 0x12d   : > { %4879 = vmatprep.subr.msk.mxu1 %vm194_vm1, %v3394_v59 }
 0x12e   : > { %4880 = vmatpush1.msk.msra.mxu1 %vm194_vm1, %v3393_v58  ;;  %v3565_v61 = vpop.permute.xlu1 %3564 }
 0x12f   : > { %v3381_v62 = vpop.permute.xlu0 %3380  ;;  %4881 = vmatmul.mubr.msk.f32.vlgmr.msra.gmra.mrb[0].mxu1 %vm190_vm2, %v4875_v60 }
 0x130   : > { %v3391_v63 = vsel %vm3390_vm5, %v3381_v62, %v3383_v54  ;;  %3723 = vmatprep.mubr.f32.mxu1 %v5160_v0 }
 0x131   : > { %4877 = vmatpush1.msk.msra.mxu0 %vm194_vm1, %v3391_v63 }
 0x132   : > { %v3569_v5 = vpop.permute.xlu1 %3568  ;;  %4878 = vmatmul.mubr.msk.f32.vlgmr.msra.gmra.mrb[0].mxu0 %vm190_vm2, %v4875_v60 }
 0x133   : > { %v3567_v1 = vpop.permute.xlu0 %3566  ;;  %3652 = vmatprep.mubr.f32.mxu0 %v5160_v0 }
 0x134   : > { %v3574_v3 = vsel %vm3572_vm6, %v3565_v61, %v3567_v1  ;;  %v3575_v4 = vsel %vm3572_vm6, %v3567_v1, %v3569_v5 }
 0x135   : > { %4883 = vmatprep.subr.msk.mxu0 %vm194_vm1, %v3574_v3 }
 0x136   : > { %v3563_v6 = vpop.permute.xlu1 %3562 }
 0x137   : > { %v3573_v7 = vsel %vm3572_vm6, %v3563_v6, %v3565_v61  ;;  %v3571_v8 = vpop.permute.xlu0 %3570 }
 0x138   : > { %v3576_v9 = vsel %vm3572_vm6, %v3569_v5, %v3571_v8  ;;  %4884 = vmatpush1.msk.msra.mxu0 %vm194_vm1, %v3573_v7 }
 0x139   : > { %4886 = vmatprep.subr.msk.mxu1 %vm194_vm1, %v3576_v9 }
 0x13a   : > { %4887 = vmatpush1.msk.msra.mxu1 %vm194_vm1, %v3575_v4  ;;  %v3749_v11 = vpop.permute.xlu1 %3748  ;;  %4885 = vmatmul.mubr.msk.f32.vlgmr.msra.gmra.mrb[0].mxu0 %vm190_vm2, %v4882_v10 }
 0x13b   : > { %v3747_v12 = vpop.permute.xlu0 %3746  ;;  %4888 = vmatmul.mubr.msk.f32.vlgmr.msra.gmra.mrb[0].mxu1 %vm190_vm2, %v4882_v10  ;;  %3834 = vmatprep.mubr.f32.mxu0 %v5160_v0 }
 0x13c   : > { %v3756_v2 = vsel %vm3754_vm7, %v3747_v12, %v3749_v11  ;;  %3905 = vmatprep.mubr.f32.mxu1 %v5160_v0 }
 0x13d   : > { %4890 = vmatprep.subr.msk.mxu0 %vm194_vm1, %v3756_v2 }
 0x13e   : > { %v3753_v13 = vpop.permute.xlu1 %3752 }
 0x13f   : > { %v3751_v14 = vpop.permute.xlu0 %3750 }
 0x140   : > { %v3757_v15 = vsel %vm3754_vm7, %v3749_v11, %v3751_v14  ;;  %v3758_v16 = vsel %vm3754_vm7, %v3751_v14, %v3753_v13 }
 0x141   : > { %4893 = vmatprep.subr.msk.mxu1 %vm194_vm1, %v3758_v16 }
 0x142   : > { %4894 = vmatpush1.msk.msra.mxu1 %vm194_vm1, %v3757_v15  ;;  %v3929_v18 = vpop.permute.xlu1 %3928 }
 0x143   : > { %v3745_v19 = vpop.permute.xlu0 %3744  ;;  %4895 = vmatmul.mubr.msk.f32.vlgmr.msra.gmra.mrb[0].mxu1 %vm190_vm2, %v4889_v17 }
 0x144   : > { %v3755_v20 = vsel %vm3754_vm7, %v3745_v19, %v3747_v12  ;;  %4087 = vmatprep.mubr.f32.mxu1 %v5160_v0 }
 0x145   : > { %4891 = vmatpush1.msk.msra.mxu0 %vm194_vm1, %v3755_v20 }
 0x146   : > { %v3933_v21 = vpop.permute.xlu1 %3932  ;;  %4892 = vmatmul.mubr.msk.f32.vlgmr.msra.gmra.mrb[0].mxu0 %vm190_vm2, %v4889_v17 }
 0x147   : > { %v3931_v22 = vpop.permute.xlu0 %3930  ;;  %4016 = vmatprep.mubr.f32.mxu0 %v5160_v0 }
 0x148   : > { %v3938_v23 = vsel %vm3936_vm8, %v3929_v18, %v3931_v22  ;;  %v3939_v29 = vsel %vm3936_vm8, %v3931_v22, %v3933_v21 }
 0x149   : > { %4897 = vmatprep.subr.msk.mxu0 %vm194_vm1, %v3938_v23 }
 0x14a   : > { %v3927_v24 = vpop.permute.xlu1 %3926 }
 0x14b   : > { %v3937_v25 = vsel %vm3936_vm8, %v3927_v24, %v3929_v18  ;;  %v3935_v26 = vpop.permute.xlu0 %3934 }
 0x14c   : > { %v3940_v27 = vsel %vm3936_vm8, %v3933_v21, %v3935_v26  ;;  %4898 = vmatpush1.msk.msra.mxu0 %vm194_vm1, %v3937_v25 }
 0x14d   : > { %4900 = vmatprep.subr.msk.mxu1 %vm194_vm1, %v3940_v27 }
 0x14e   : > { %4901 = vmatpush1.msk.msra.mxu1 %vm194_vm1, %v3939_v29  ;;  %v4113_v30 = vpop.permute.xlu1 %4112  ;;  %4899 = vmatmul.mubr.msk.f32.vlgmr.msra.gmra.mrb[0].mxu0 %vm190_vm2, %v4896_v28 }
 0x14f   : > { %v4111_v31 = vpop.permute.xlu0 %4110  ;;  %4902 = vmatmul.mubr.msk.f32.vlgmr.msra.gmra.mrb[0].mxu1 %vm190_vm2, %v4896_v28  ;;  %4198 = vmatprep.mubr.f32.mxu0 %v5160_v0 }
 0x150   : > { %v4120_v32 = vsel %vm4118_vm9, %v4111_v31, %v4113_v30  ;;  %4269 = vmatprep.mubr.f32.mxu1 %v5160_v0 }
 0x151   : > { %4904 = vmatprep.subr.msk.mxu0 %vm194_vm1, %v4120_v32 }
 0x152   : > { %v4117_v33 = vpop.permute.xlu1 %4116 }
 0x153   : > { %v4115_v34 = vpop.permute.xlu0 %4114 }
 0x154   : > { %v4121_v35 = vsel %vm4118_vm9, %v4113_v30, %v4115_v34  ;;  %v4122_v36 = vsel %vm4118_vm9, %v4115_v34, %v4117_v33 }
 0x155   : > { %4907 = vmatprep.subr.msk.mxu1 %vm194_vm1, %v4122_v36 }
 0x156   : > { %4908 = vmatpush1.msk.msra.mxu1 %vm194_vm1, %v4121_v35  ;;  %v4293_v38 = vpop.permute.xlu1 %4292 }
 0x157   : > { %v4109_v39 = vpop.permute.xlu0 %4108  ;;  %4909 = vmatmul.mubr.msk.f32.vlgmr.msra.gmra.mrb[0].mxu1 %vm190_vm2, %v4903_v37 }
 0x158   : > { %v4119_v40 = vsel %vm4118_vm9, %v4109_v39, %v4111_v31  ;;  %4451 = vmatprep.mubr.f32.mxu1 %v5160_v0 }
 0x159   : > { %4905 = vmatpush1.msk.msra.mxu0 %vm194_vm1, %v4119_v40 }
 0x15a   : > { %v4297_v41 = vpop.permute.xlu1 %4296  ;;  %4906 = vmatmul.mubr.msk.f32.vlgmr.msra.gmra.mrb[0].mxu0 %vm190_vm2, %v4903_v37 }
 0x15b   : > { %v4295_v42 = vpop.permute.xlu0 %4294  ;;  %4380 = vmatprep.mubr.f32.mxu0 %v5160_v0 }
 0x15c   : > { %v4302_v43 = vsel %vm4300_vm10, %v4293_v38, %v4295_v42  ;;  %v4303_v49 = vsel %vm4300_vm10, %v4295_v42, %v4297_v41 }
 0x15d   : > { %4911 = vmatprep.subr.msk.mxu0 %vm194_vm1, %v4302_v43 }
 0x15e   : > { %v4291_v44 = vpop.permute.xlu1 %4290 }
 0x15f   : > { %v4301_v45 = vsel %vm4300_vm10, %v4291_v44, %v4293_v38  ;;  %v4299_v46 = vpop.permute.xlu0 %4298 }
 0x160   : > { %v4304_v47 = vsel %vm4300_vm10, %v4297_v41, %v4299_v46  ;;  %4912 = vmatpush1.msk.msra.mxu0 %vm194_vm1, %v4301_v45 }
 0x161   : > { %4914 = vmatprep.subr.msk.mxu1 %vm194_vm1, %v4304_v47 }
 0x162   : > { %4915 = vmatpush1.msk.msra.mxu1 %vm194_vm1, %v4303_v49  ;;  %v4477_v50 = vpop.permute.xlu1 %4476  ;;  %4913 = vmatmul.mubr.msk.f32.vlgmr.msra.gmra.mrb[0].mxu0 %vm190_vm2, %v4910_v48 }
 0x163   : > { %4916 = vmatmul.mubr.msk.f32.vlgmr.msra.gmra.mrb[0].mxu1 %vm190_vm2, %v4910_v48  ;;  %v4475_v51 = vpop.permute.xlu0 %4474  ;;  %4562 = vmatprep.mubr.f32.mxu0 %v5160_v0 }
 0x164   : > { %v4484_v52 = vsel %vm4482_vm11, %v4475_v51, %v4477_v50  ;;  %4633 = vmatprep.mubr.f32.mxu1 %v5160_v0 }
 0x165   : > { %4918 = vmatprep.subr.msk.mxu0 %vm194_vm1, %v4484_v52 }
 0x166   : > { %v4481_v53 = vpop.permute.xlu1 %4480 }
 0x167   : > { %v4479_v54 = vpop.permute.xlu0 %4478 }
 0x168   : > { %v4485_v55 = vsel %vm4482_vm11, %v4477_v50, %v4479_v54  ;;  %v4486_v56 = vsel %vm4482_vm11, %v4479_v54, %v4481_v53 }
 0x169   : > { %4921 = vmatprep.subr.msk.mxu1 %vm194_vm1, %v4486_v56 }
 0x16a   : > { %4922 = vmatpush1.msk.msra.mxu1 %vm194_vm1, %v4485_v55 }
 0x16b   : > { %4923 = vmatmul.mubr.msk.f32.vlgmr.msra.gmra.mrb[0].mxu1 %vm190_vm2, %v4917_v57  ;;  %v4473_v58 = vpop.permute.xlu0 %4472 }
 0x16c   : > { %v4483_v0 = vsel %vm4482_vm11, %v4473_v58, %v4475_v51 }
 0x16d   : > { %4919 = vmatpush1.msk.msra.mxu0 %vm194_vm1, %v4483_v0 }
 0x16e   : > { %4920 = vmatmul.mubr.msk.f32.vlgmr.msra.gmra.mrb[0].mxu0 %vm190_vm2, %v4917_v57 }
 0x177   : > { %v4648_v59 = vpop.permute.xlu1 %4647 }
 0x23e   : > { %v4635_v60 = vpop.f32.mrb[0].mxu1 }
 0x23f   : > { %v4652_v61 = vadd.f32 %v4648_v59, %v4635_v60  ;;  %v4637_v62 = vpop.f32.mrb[1].mxu1 }
 0x240   : > { %v4653_v63 = vadd.f32 %v4648_v59, %v4637_v62 }
 0x241   : > { %v4656_v5 = vmax.f32 %v4652_v61, 0.0  ;;  %v4564_v1 = vpop.f32.mrb[0].mxu0 }
 0x242   : > { %v4657_v3 = vmax.f32 %v4653_v63, 0.0  ;;  %v4650_v6 = vadd.f32 %v4648_v59, %v4564_v1  ;;  %v4566_v7 = vpop.f32.mrb[1].mxu0 }
 0x243   : > { %v4651_v8 = vadd.f32 %v4648_v59, %v4566_v7 }
 0x244   : > { %v4663_v9 = vcombine.low %v4656_v5, %v4657_v3  ;;  %v4654_v10 = vmax.f32 %v4650_v6, 0.0 }
 0x245   : > { %v4655_v4 = vmax.f32 %v4651_v8, 0.0 }
 0x246   : > { %4669 = vst.msk [vmem:[%s163_s11 + $0x8] sm:$0xff] %vm4668_vm13, %v4663_v9 }
 0x247   : > { %v4662_v11 = vcombine.low %v4654_v10, %v4655_v4 }
 0x249   : > { %4666 = vst [vmem:[%s163_s11] sm:$0xff] %v4662_v11 }
 0x24a   : > { %5109 = shalt.err (!%p5106_p3)
}
 0x24b   : > { %s5110_s29 = scalar_lea.hbm %s5747_s24, 256  ;;  %s5114_s5 = scalar_lea.hbm %s5792_s3, 512 }
 0x24c   : > { %p5111_p4 = scmp.ne.s32.totalorder %s5747_s24, %s5110_s29  ;;  %p5115_p9 = scmp.lt.u32.totalorder %s5747_s24, %s5792_s3 }
 0x24d   : > { %p5116_p10 = scmp.lt.u32.totalorder %s5114_s5, %s5110_s29  ;;  %p5118_p12 = scmp.lt.u32.totalorder %s5110_s29, %s5747_s24 }
 0x24e   : > { %p5112_p7 = pnand %p5111_p4, %p5245_p5 }
 0x24f   : > { %p5117_p11 = por %p5116_p10, %p5115_p9 }
 0x250   : > { %p5113_p8 = pneg %p5112_p7 }
 0x251   : > { %p5119_p13 = por %p5118_p12, %p5117_p11 }
 0x253   : > { %p5120_p0 = pnand %p5119_p13, %p5113_p8 }
 0x255   : > { %5123 = shalt.err (!%p5120_p0)
}
 0x256   : > { %5027 = dma.vmem_to_hbm [thread:$0]  (%p5245_p5), %s5749_s17, 256, %s5747_s24, %s4671_s25  }
 0x257 PF: > { %p5033_p1 = scmp.ge.s32.totalorder %s5158_s15, 2  ;;  %s4697_s8 = sand.u32 1, %s5146_s12  }
 0x258   : > { %s4698_s9 = scalar_lea.sflag [#allocation3], %s4697_s8 }
 0x259   : > { %p5030_p2 = pnand %p5033_p1, %p5249_p6 }
 0x25b   : > { %5141 = dma.done.wait (!%p5030_p2), %s4698_s9, 256  }
 0x25c   : > { %5143 = vsyncadd (!%p5030_p2), %s4698_s9, 4294967040  ;;  %p13_p3 = scmp.ge.s32.totalorder %s5232_s18, 4   ;;  %s5795_s12 = smov %s5150_s13 }
 0x25d   : > { %s5796_s13 = smov %s5154_s14  ;;  %s5797_s14 = smov %s5243_s21 }
 0x25e   : > { %s5798_s15 = smov %s5232_s18  ;;  %15 = sbr.rel (!%p13_p3) target bundleno = 3 (0x3), region = 91 }
 0x265   :  { %4703 = vsyncpa [#allocation3], 1 }
 0x266   :  { %4705 = vsyncpa [#allocation3 + $0x1], 1 }

</bundles_post_ra>
